<compile_context>
chip_gen: v7x
topology: tpu7x:2x2x1
jax: 0.10.0
libtpu: 0.0.40
codegen_flags: <defaults>
</compile_context>

<pallas_src>
import jax
import jax.numpy as jnp
from jax import lax
import numpy as np
from jax.experimental import pallas as pl
from jax.experimental.pallas import tpu as pltpu

_EPS = 1e-8  # torch.cosine_similarity default eps


def _edge_weight_kernel(node_ref, sent_ref, w_ls_ref, wn_t_ref, out_ref):
    f32 = jnp.float32
    node = node_ref[...]          # (TB, S, D)
    sent = sent_ref[...]          # (TB, S, D)
    tb, s, d = node.shape

    # Flatten batch into the MXU M dimension: one big matmul instead of TB
    # tiny per-batch (S, D) @ (D, D) slivers.  (Leading-dim collapse with the
    # last dim unchanged is a layout no-op.)
    node2d = node.reshape(tb * s, d)
    sent2d = sent.reshape(tb * s, d)

    # Fused sent-path weights: one (TB*S, D) @ (D, 2D) push yields both
    # sent @ Wl^T and sent @ Ws^T.  Node path: one (TB*S, D) @ (D, D) push.
    sent_lw = jnp.dot(sent2d, w_ls_ref[...], preferred_element_type=f32)   # (TB*S, 2D)
    node_wn = jnp.dot(node2d, wn_t_ref[...],
                      preferred_element_type=f32).reshape(tb, s, d)        # node @ Wn^T

    sent_wl = sent_lw[:, :d].reshape(tb, s, d)      # sent @ Wl^T
    sent_ws = sent_lw[:, d:].reshape(tb, s, d)      # sent @ Ws^T

    # F^T = tanh((sent @ Wl^T) @ node^T): computed already transposed so the
    # next contraction runs over its LAST dim (MXU-canonical, no transpose).
    f_t = jnp.tanh(jnp.einsum('bid,bjd->bij', sent_wl, node,
                              preferred_element_type=f32))                 # (TB, S, S)

    # R = tanh(node @ Wn^T + F^T @ (sent @ Ws^T))
    ft_sw = jnp.einsum('bij,bjd->bid', f_t, sent_ws,
                       preferred_element_type=f32)                         # (TB, S, D)
    r = jnp.tanh(node_wn + ft_sw)                                          # (TB, S, D)

    # Pairwise cosine similarity, torch semantics (per-norm eps clamp):
    #   cos[i,j] = node[i].R[j] / (max(|node[i]|,eps) * max(|R[j]|,eps))
    dots = jnp.einsum('bid,bjd->bij', node, r,
                      preferred_element_type=f32)                          # (TB, S, S)
    eps2 = jnp.float32(_EPS * _EPS)
    inv_node = lax.rsqrt(jnp.maximum(
        jnp.sum(node * node, axis=-1, keepdims=True), eps2))               # (TB, S, 1)
    inv_r = lax.rsqrt(jnp.maximum(jnp.sum(r * r, axis=-1), eps2))          # (TB, S)
    cos = dots * inv_node * inv_r[:, None, :]

    # clamp(min=0).  S*S = 64 < 128 lanes, so a flattened block could not
    # reach an unmasked vst anyway; keep (TB, S, S), host flattens for free.
    out_ref[...] = jnp.maximum(cos, 0.0)


def _pick_block_b(B, S):
    """Pick the batch tile: fill the MXU M dim, keep grid aligned to TC count."""
    kind = ""
    try:
        kind = jax.devices()[0].device_kind.lower()
    except Exception:
        pass
    num_tc = 2 if "v7" in kind else 1          # v7x: 2 TensorCores per chip
    target_rows = 128 if "v5" in kind else 256  # MXU M: 128 (v5e) / 256 (v6e/v7x)

    divisors = [d for d in range(1, B + 1) if B % d == 0]
    aligned = [d for d in divisors if (B // d) % num_tc == 0]
    cands = aligned if aligned else divisors
    filling = [d for d in cands if d * S >= target_rows]
    # Smallest tile that fills the MXU M dimension (keeps per-step VMEM small
    # for big batches); otherwise the biggest tile we can get.
    return min(filling) if filling else max(cands)


def edge_weight_cal1_batched(node_feature, sent_feature, wl, wn, ws,
                             *, block_b=None):
    """node/sent: (B, S, D) f32; wl/wn/ws: (D, D). Returns (B, S*S) f32."""
    B, S, D = node_feature.shape
    if block_b is None:
        block_b = _pick_block_b(B, S)
    elif B % block_b != 0:
        # Largest divisor of B not exceeding the requested block_b (never
        # silently collapse to grid=(1,)).
        block_b = max(d for d in range(1, block_b + 1) if B % d == 0)
    grid = (B // block_b,)

    # Host-side weight prep is free (fused by XLA):
    #   w_ls = [Wl^T | Ws^T]  -> one fused (D, 2D) weight for the sent path.
    w_ls = jnp.concatenate([wl.T, ws.T], axis=1)   # (D, 2D)
    wn_t = wn.T                                    # (D, D)

    out = pl.pallas_call(
        _edge_weight_kernel,
        out_shape=jax.ShapeDtypeStruct((B, S, S), jnp.float32),
        grid_spec=pltpu.PrefetchScalarGridSpec(
            num_scalar_prefetch=0,
            grid=grid,
            in_specs=[
                pl.BlockSpec((block_b, S, D), lambda b: (b, 0, 0)),
                pl.BlockSpec((block_b, S, D), lambda b: (b, 0, 0)),
                pl.BlockSpec((D, 2 * D), lambda b: (0, 0)),   # [Wl^T | Ws^T]
                pl.BlockSpec((D, D), lambda b: (0, 0)),       # Wn^T
            ],
            out_specs=pl.BlockSpec((block_b, S, S), lambda b: (b, 0, 0)),
        ),
        compiler_params=pltpu.CompilerParams(
            dimension_semantics=("parallel",),   # shards over 2 TCs on v7x
        ),
    )(node_feature, sent_feature, w_ls, wn_t)
    return out.reshape(B, S * S)


def edge_weight_cal1(node_feature, sent_feature, wl, wn, ws):
    """Single-instance forward matching the PyTorch module: (S,D),(S,D)->(S*S,).

    Note: at B=1 the pallas_call fixed cost dwarfs the ~60 KFLOP of compute;
    prefer batching at the caller via edge_weight_cal1_batched.
    """
    out = edge_weight_cal1_batched(node_feature[None], sent_feature[None],
                                   wl, wn, ws)
    # TODO(synk): .clone().detach().requires_grad_(True) is autograd/device
    # bookkeeping with no Pallas equivalent; numerics are unchanged.
    return out.reshape(-1)


def _reference(node, sent, wl, wn, ws):
    f_mat = jnp.tanh(node @ (wl @ sent.T))
    rt = jnp.tanh(wn @ node.T + (ws @ sent.T) @ f_mat)
    r = rt.T
    node_n = jnp.maximum(jnp.linalg.norm(node, axis=1, keepdims=True), _EPS)
    r_n = jnp.maximum(jnp.linalg.norm(r, axis=1, keepdims=True), _EPS)
    cos = (node / node_n) @ (r / r_n).T
    return jnp.maximum(cos, 0.0).reshape(-1)


if __name__ == "__main__":
    B, S, D = 16, 8, 32   # batch of independent (seq=8, hidden=32) instances
    key = jax.random.PRNGKey(0)
    k_node, k_sent, k_wl, k_wn, k_ws = jax.random.split(key, 5)

    node_feature = jax.random.normal(k_node, (B, S, D), dtype=jnp.float32)
    sent_feature = jax.random.normal(k_sent, (B, S, D), dtype=jnp.float32)
    # torch.rand -> uniform [0, 1)
    Wl = jax.random.uniform(k_wl, (D, D), dtype=jnp.float32)
    Wn = jax.random.uniform(k_wn, (D, D), dtype=jnp.float32)
    Ws = jax.random.uniform(k_ws, (D, D), dtype=jnp.float32)

    # Batched path: one pallas_call; block_b chosen per TPU generation
    # (grid=(1,) on single-TC v5e/v6e, grid=(2,) on dual-TC v7x at B=16).
    edge_b = jax.block_until_ready(
        edge_weight_cal1_batched(node_feature, sent_feature, Wl, Wn, Ws))

    # Single-instance path, identical to the PyTorch module's forward().
    edge_0 = jax.block_until_ready(
        edge_weight_cal1(node_feature[0], sent_feature[0], Wl, Wn, Ws))

    ref_b = jnp.stack([_reference(node_feature[b], sent_feature[b], Wl, Wn, Ws)
                       for b in range(B)])
    np.testing.assert_allclose(np.asarray(edge_b), np.asarray(ref_b),
                               rtol=1e-4, atol=1e-5)
    np.testing.assert_allclose(np.asarray(edge_0), np.asarray(ref_b[0]),
                               rtol=1e-4, atol=1e-5)
    print("KERNEL_OK")
</pallas_src>

<mosaic_0001>
module attributes {stable_mosaic.version = 11 : i64} {
  func.func @_edge_weight_kernel(%arg0: i32, %arg1: memref<16x8x32xf32, #tpu.memory_space<vmem>>, %arg2: memref<16x8x32xf32, #tpu.memory_space<vmem>>, %arg3: memref<32x64xf32, #tpu.memory_space<vmem>>, %arg4: memref<32x32xf32, #tpu.memory_space<vmem>>, %arg5: memref<16x8x8xf32, #tpu.memory_space<vmem>>) attributes {dimension_semantics = [#tpu.dimension_semantics<parallel>], iteration_bounds = array<i64: 1>, scalar_prefetch = 0 : i64, scratch_operands = 0 : i64, tpu.core_type = #tpu.core_type<tc>, window_params = [{transform_indices = @transform_0, window_bounds = array<i64: 16, 8, 32>}, {transform_indices = @transform_1, window_bounds = array<i64: 16, 8, 32>}, {pipeline_mode = #tpu.pipeline_mode<synchronous>, transform_indices = @transform_2, window_bounds = array<i64: 32, 64>}, {pipeline_mode = #tpu.pipeline_mode<synchronous>, transform_indices = @transform_3, window_bounds = array<i64: 32, 32>}, {transform_indices = @transform_4, window_bounds = array<i64: 16, 8, 8>}]} {
    %c0 = arith.constant 0 : index
    %c0_0 = arith.constant 0 : index
    %c0_1 = arith.constant 0 : index
    %0 = vector.load %arg1[%c0, %c0_0, %c0_1] : memref<16x8x32xf32, #tpu.memory_space<vmem>>, vector<16x8x32xf32>
    %c0_2 = arith.constant 0 : index
    %c0_3 = arith.constant 0 : index
    %c0_4 = arith.constant 0 : index
    %1 = vector.load %arg2[%c0_2, %c0_3, %c0_4] : memref<16x8x32xf32, #tpu.memory_space<vmem>>, vector<16x8x32xf32>
    %2 = vector.shape_cast %0 : vector<16x8x32xf32> to vector<128x32xf32>
    %3 = vector.shape_cast %1 : vector<16x8x32xf32> to vector<128x32xf32>
    %c0_5 = arith.constant 0 : index
    %c0_6 = arith.constant 0 : index
    %4 = vector.load %arg3[%c0_5, %c0_6] : memref<32x64xf32, #tpu.memory_space<vmem>>, vector<32x64xf32>
    %cst = arith.constant dense<0.000000e+00> : vector<128x64xf32>
    %5 = tpu.matmul %3, %4, %cst {dimension_numbers = #tpu.dot_dimension_numbers<[1], [0], [0], [1], [0, 0, 1, 1], [], []>} : vector<128x32xf32>, vector<32x64xf32>, vector<128x64xf32> -> vector<128x64xf32>
    %c0_7 = arith.constant 0 : index
    %c0_8 = arith.constant 0 : index
    %6 = vector.load %arg4[%c0_7, %c0_8] : memref<32x32xf32, #tpu.memory_space<vmem>>, vector<32x32xf32>
    %cst_9 = arith.constant dense<0.000000e+00> : vector<128x32xf32>
    %7 = tpu.matmul %2, %6, %cst_9 {dimension_numbers = #tpu.dot_dimension_numbers<[1], [0], [0], [1], [0, 0, 1, 1], [], []>} : vector<128x32xf32>, vector<32x32xf32>, vector<128x32xf32> -> vector<128x32xf32>
    %8 = vector.shape_cast %7 : vector<128x32xf32> to vector<16x8x32xf32>
    %9 = vector.extract_strided_slice %5 {offsets = [0, 0], sizes = [128, 32], strides = [1, 1]} : vector<128x64xf32> to vector<128x32xf32>
    %10 = vector.shape_cast %9 : vector<128x32xf32> to vector<16x8x32xf32>
    %11 = vector.extract_strided_slice %5 {offsets = [0, 32], sizes = [128, 32], strides = [1, 1]} : vector<128x64xf32> to vector<128x32xf32>
    %12 = vector.shape_cast %11 : vector<128x32xf32> to vector<16x8x32xf32>
    "tpu.trace_start"() <{level = 10 : i32, message = "bid,bjd->bij"}> : () -> ()
    %cst_10 = arith.constant dense<0.000000e+00> : vector<16x8x8xf32>
    %13 = tpu.matmul %10, %0, %cst_10 {dimension_numbers = #tpu.dot_dimension_numbers<[2], [2], [1], [1], [0, 0, 0, 1, 1, 1], [0], [0]>} : vector<16x8x32xf32>, vector<16x8x32xf32>, vector<16x8x8xf32> -> vector<16x8x8xf32>
    "tpu.trace_stop"() : () -> ()
    %14 = math.tanh %13 : vector<16x8x8xf32>
    "tpu.trace_start"() <{level = 10 : i32, message = "bij,bjd->bid"}> : () -> ()
    %cst_11 = arith.constant dense<0.000000e+00> : vector<16x8x32xf32>
    %15 = tpu.matmul %14, %12, %cst_11 {dimension_numbers = #tpu.dot_dimension_numbers<[2], [1], [1], [2], [0, 0, 0, 1, 1, 2], [0], [0]>} : vector<16x8x8xf32>, vector<16x8x32xf32>, vector<16x8x32xf32> -> vector<16x8x32xf32>
    "tpu.trace_stop"() : () -> ()
    %16 = arith.addf %8, %15 : vector<16x8x32xf32>
    %17 = math.tanh %16 : vector<16x8x32xf32>
    "tpu.trace_start"() <{level = 10 : i32, message = "bid,bjd->bij"}> : () -> ()
    %cst_12 = arith.constant dense<0.000000e+00> : vector<16x8x8xf32>
    %18 = tpu.matmul %0, %17, %cst_12 {dimension_numbers = #tpu.dot_dimension_numbers<[2], [2], [1], [1], [0, 0, 0, 1, 1, 1], [0], [0]>} : vector<16x8x32xf32>, vector<16x8x32xf32>, vector<16x8x8xf32> -> vector<16x8x8xf32>
    "tpu.trace_stop"() : () -> ()
    %19 = arith.mulf %0, %0 : vector<16x8x32xf32>
    %cst_13 = arith.constant dense<0.000000e+00> : vector<16x8xf32>
    %20 = vector.multi_reduction <add>, %19, %cst_13 [2] : vector<16x8x32xf32> to vector<16x8xf32>
    %21 = vector.shape_cast %20 : vector<16x8xf32> to vector<16x8x1xf32>
    %cst_14 = arith.constant 1.000000e-16 : f32
    %22 = vector.broadcast %cst_14 : f32 to vector<16x8x1xf32>
    %23 = arith.maximumf %21, %22 : vector<16x8x1xf32>
    %24 = math.rsqrt %23 : vector<16x8x1xf32>
    %25 = arith.mulf %17, %17 : vector<16x8x32xf32>
    %cst_15 = arith.constant dense<0.000000e+00> : vector<16x8xf32>
    %26 = vector.multi_reduction <add>, %25, %cst_15 [2] : vector<16x8x32xf32> to vector<16x8xf32>
    %cst_16 = arith.constant 1.000000e-16 : f32
    %27 = vector.broadcast %cst_16 : f32 to vector<16x8xf32>
    %28 = arith.maximumf %26, %27 : vector<16x8xf32>
    %29 = math.rsqrt %28 : vector<16x8xf32>
    %30 = vector.broadcast %24 : vector<16x8x1xf32> to vector<16x8x8xf32>
    %31 = arith.mulf %18, %30 : vector<16x8x8xf32>
    %32 = vector.shape_cast %29 : vector<16x8xf32> to vector<16x1x8xf32>
    %33 = vector.broadcast %32 : vector<16x1x8xf32> to vector<16x8x8xf32>
    %34 = arith.mulf %31, %33 : vector<16x8x8xf32>
    %cst_17 = arith.constant 0.000000e+00 : f32
    %35 = vector.broadcast %cst_17 : f32 to vector<16x8x8xf32>
    %36 = arith.maximumf %34, %35 : vector<16x8x8xf32>
    %c0_18 = arith.constant 0 : index
    %c0_19 = arith.constant 0 : index
    %c0_20 = arith.constant 0 : index
    %37 = vector.load %arg5[%c0_18, %c0_19, %c0_20] : memref<16x8x8xf32, #tpu.memory_space<vmem>>, vector<16x8x8xf32>
    tpu.vector_store %arg5[%c0_18, %c0_19, %c0_20], %36 {strides = array<i32>} : memref<16x8x8xf32, #tpu.memory_space<vmem>>, vector<16x8x8xf32>,
    return
  }
  func.func @transform_0(%arg0: i32) -> (i32, i32, i32) {
    %c0_i32 = arith.constant 0 : i32
    %c0_i32_0 = arith.constant 0 : i32
    %c0_i32_1 = arith.constant 0 : i32
    return %arg0, %c0_i32, %c0_i32_0 : i32, i32, i32
  }
  func.func @transform_1(%arg0: i32) -> (i32, i32, i32) {
    %c0_i32 = arith.constant 0 : i32
    %c0_i32_0 = arith.constant 0 : i32
    %c0_i32_1 = arith.constant 0 : i32
    return %arg0, %c0_i32, %c0_i32_0 : i32, i32, i32
  }
  func.func @transform_2(%arg0: i32) -> (i32, i32) {
    %c0_i32 = arith.constant 0 : i32
    %c0_i32_0 = arith.constant 0 : i32
    %c0_i32_1 = arith.constant 0 : i32
    return %c0_i32, %c0_i32_0 : i32, i32
  }
  func.func @transform_3(%arg0: i32) -> (i32, i32) {
    %c0_i32 = arith.constant 0 : i32
    %c0_i32_0 = arith.constant 0 : i32
    %c0_i32_1 = arith.constant 0 : i32
    return %c0_i32, %c0_i32_0 : i32, i32
  }
  func.func @transform_4(%arg0: i32) -> (i32, i32, i32) {
    %c0_i32 = arith.constant 0 : i32
    %c0_i32_0 = arith.constant 0 : i32
    %c0_i32_1 = arith.constant 0 : i32
    return %arg0, %c0_i32, %c0_i32_0 : i32, i32, i32
  }
}

</mosaic_0001>

<bundles_post_ra>
// kernel: tpu_custom_call.1
= control target key start
LH: loop header
LB: loop body
LE: loop exit
PB: predicated region body
PF: predicated region fallthrough
CT: control target
= control target key end

     0   :  { %9 = vsyncpa [#allocation3], 0  ;;  %s6043_s0 = inlined_call_operand.hbm [shape: f32[16,8,32], index: 0, kind: input, shape index: {}]   ;;  %s6044_s1 = inlined_call_operand.hbm [shape: f32[16,8,32], index: 1, kind: input, shape index: {}]   ;;  %s6045_s2 = inlined_call_operand.hbm [shape: f32[32,64], index: 2, kind: input, shape index: {}]   ;;  %s6046_s3 = inlined_call_operand.hbm [shape: f32[32,32], index: 3, kind: input, shape index: {}]   ;;  %s6047_s4 = inlined_call_operand.vmem [shape: f32[16,8,8], index: 4, kind: output, shape index: {}]  }
   0x1   :  { %10 = vsyncpa [#allocation5], 0 }
   0x2   :  { %11 = vsyncpa [#allocation8], 0  ;;  %s5362_s15 = smov [#allocation4]   ;;  %s5363_s17 = smov [#allocation2]  }
   0x3   :  { %s29_s16 = sshll.u32 %s5362_s15, 4  ;;  %s17_s18 = sshll.u32 %s5363_s17, 4  ;;  %s30_s16 = int_to_ptr.vmem [resolvable:$true] %s29_s16  ;;  %s5396_s18 = int_to_ptr.vmem [resolvable:$true] %s17_s18 }
   0x4   :  { %s5268_s21 = scalar_lea.hbm %s6044_s1, 2048 }
   0x5   :  { %p5269_p0 = scmp.ne.s32.totalorder %s6044_s1, %s5268_s21  ;;  %p5272_p1 = scmp.lt.u32.totalorder %s5268_s21, %s6044_s1 }
   0x7   :  { %p5274_p2 = pnand %p5272_p1, %p5269_p0 }
   0x9   :  { %5277 = shalt.err (!%p5274_p2)
}
   0xa   :  { %s5278_s26 = scalar_lea.vmem %s30_s16, 2048  ;;  %p5283_p4 = scmp.lt.s32.totalorder %s30_s16, %s30_s16 }
   0xb   :  { %p5279_p3 = scmp.ne.s32.totalorder %s30_s16, %s5278_s26  ;;  %p5284_p5 = scmp.lt.s32.totalorder %s5278_s26, %s5278_s26 }
   0xd   :  { %p5285_p6 = por %p5284_p5, %p5283_p4 }
   0xf   :  { %p5286_p7 = pnand %p5285_p6, %p5279_p3 }
  0x11   :  { %5289 = shalt.err (!%p5286_p7)
}
  0x12   :  { %s5364_s27 = smov 128   ;;  %s5365_s28 = smov 8  }
  0x13   :  { %35 = dma.hbm_to_vmem [thread:$0]  %s6044_s1, 2048, %s30_s16, [#allocation5], %s5364_s27, %s5364_s27, %s5365_s28  }
  0x14   :  { %s5290_s7 = scalar_lea.hbm %s6043_s0, 2048 }
  0x15   :  { %p5291_p8 = scmp.ne.s32.totalorder %s6043_s0, %s5290_s7  ;;  %p5294_p9 = scmp.lt.u32.totalorder %s5290_s7, %s6043_s0 }
  0x17   :  { %p5296_p10 = pnand %p5294_p9, %p5291_p8 }
  0x19   :  { %5299 = shalt.err (!%p5296_p10)
}
  0x1a   :  { %s5300_s12 = scalar_lea.vmem %s5396_s18, 2048  ;;  %p5305_p12 = scmp.lt.s32.totalorder %s5396_s18, %s5396_s18 }
  0x1b   :  { %p5301_p11 = scmp.ne.s32.totalorder %s5396_s18, %s5300_s12  ;;  %p5306_p13 = scmp.lt.s32.totalorder %s5300_s12, %s5300_s12 }
  0x1d   :  { %p5307_p0 = por %p5306_p13, %p5305_p12 }
  0x1f   :  { %p5308_p1 = pnand %p5307_p0, %p5301_p11 }
  0x21   :  { %5311 = shalt.err (!%p5308_p1)
}
  0x22   :  { %23 = dma.hbm_to_vmem [thread:$0]  %s6043_s0, 2048, %s5396_s18, [#allocation3], %s5364_s27, %s5364_s27, %s5365_s28  }
  0x23   :  { %s5366_s14 = smov [#allocation6]   ;;  %s5367_s16 = smov [#allocation7]  }
  0x24   :  { %s41_s15 = sshll.u32 %s5366_s14, 4  ;;  %s53_s17 = sshll.u32 %s5367_s16, 4  ;;  %s42_s15 = int_to_ptr.vmem [resolvable:$true] %s41_s15  ;;  %s5433_s17 = int_to_ptr.vmem [resolvable:$true] %s53_s17 }
  0x25   :  { %s5312_s21 = scalar_lea.hbm %s6045_s2, 512 }
  0x26   :  { %p5313_p2 = scmp.ne.s32.totalorder %s6045_s2, %s5312_s21  ;;  %p5316_p3 = scmp.lt.u32.totalorder %s5312_s21, %s6045_s2 }
  0x28   :  { %p5318_p4 = pnand %p5316_p3, %p5313_p2 }
  0x2a   :  { %5321 = shalt.err (!%p5318_p4)
}
  0x2b   :  { %s5322_s0 = scalar_lea.vmem %s42_s15, 512  ;;  %p5327_p6 = scmp.lt.s32.totalorder %s42_s15, %s42_s15 }
  0x2c   :  { %p5323_p5 = scmp.ne.s32.totalorder %s42_s15, %s5322_s0  ;;  %p5328_p7 = scmp.lt.s32.totalorder %s5322_s0, %s5322_s0 }
  0x2e   :  { %p5329_p8 = por %p5328_p7, %p5327_p6 }
  0x30   :  { %p5330_p9 = pnand %p5329_p8, %p5323_p5 }
  0x32   :  { %5333 = shalt.err (!%p5330_p9)
}
  0x33   :  { %47 = dma.hbm_to_vmem [thread:$0]  %s6045_s2, 512, %s42_s15, [#allocation5], %s5364_s27, %s5364_s27, %s5365_s28  }
  0x34   :  { %s5334_s5 = scalar_lea.hbm %s6046_s3, 512 }
  0x35   :  { %p5335_p10 = scmp.ne.s32.totalorder %s6046_s3, %s5334_s5  ;;  %p5338_p11 = scmp.lt.u32.totalorder %s5334_s5, %s6046_s3 }
  0x37   :  { %p5340_p12 = pnand %p5338_p11, %p5335_p10 }
  0x39   :  { %5343 = shalt.err (!%p5340_p12)
}
  0x3a   :  { %s5344_s10 = scalar_lea.vmem %s5433_s17, 512  ;;  %p5349_p0 = scmp.lt.s32.totalorder %s5433_s17, %s5433_s17 }
  0x3b   :  { %p5345_p13 = scmp.ne.s32.totalorder %s5433_s17, %s5344_s10  ;;  %p5350_p1 = scmp.lt.s32.totalorder %s5344_s10, %s5344_s10 }
  0x3d   :  { %p5351_p2 = por %p5350_p1, %p5349_p0 }
  0x3f   :  { %p5352_p3 = pnand %p5351_p2, %p5345_p13 }
  0x41   :  { %5355 = shalt.err (!%p5352_p3)
}
  0x42   :  { %59 = dma.hbm_to_vmem [thread:$0]  %s6046_s3, 512, %s5433_s17, [#allocation8], %s5364_s27, %s5364_s27, %s5365_s28  }
  0x43   :  { %5356 = dma.done.wait [#allocation3], 2048  }
  0x44   :  { %5357 = vsyncadd [#allocation3], 4294965248 }
  0x45   :  { %5358 = dma.done.wait [#allocation5], 2560  }
  0x46   :  { %5359 = vsyncadd [#allocation5], 4294964736 }
  0x47   :  { %5360 = dma.done.wait [#allocation8], 512  }
  0x48   :  { %5361 = vsyncadd [#allocation8], 4294966784  ;;  %vm108_vm0 = vcmask 261120   ;;  %v104_v0 = vld [vmem:[#allocation6] sm:$0xff]  ;;  %v105_v1 = vld [vmem:[#allocation6 + $0x8] sm:$0xff]  ;;  %v5368_v16 = vmov 0.0  }
  0x49   :  { %v106_v2 = vld [vmem:[#allocation6 + $0x10] sm:$0xff]  ;;  %v5115_v3 = vpack.c.bf16 %v105_v1, %v104_v0  ;;  %v107_v4 = vld [vmem:[#allocation6 + $0x18] sm:$0xff]  ;;  %v88_v5 = vld [vmem:[#allocation4] sm:$0xff]  ;;  %vm5369_vm1 = vmmov 0   ;;  %s5370_s3 = smov 96   ;;  %vm1686_vm2 = vcmask 64512  }
  0x4a   :  { %v5119_v6 = vpack.c.bf16 %v107_v4, %v106_v2  ;;  %4819 = vmatprep.mubr.msk.f32.mxu0 %vm108_vm0, %v88_v5  ;;  %v302_v7 = vld [vmem:[#allocation7] sm:$0xff]  ;;  %v303_v8 = vld [vmem:[#allocation7 + $0x8] sm:$0xff]  ;;  %v304_v9 = vld [vmem:[#allocation7 + $0x10] sm:$0xff] }
  0x4b   :  { %5116 = vmatprep.subr.bf16.mxu0 %v5115_v3  ;;  %v305_v10 = vld [vmem:[#allocation7 + $0x18] sm:$0xff]  ;;  %v89_v11 = vld [vmem:[#allocation4 + $0x8] sm:$0xff]  ;;  %v5123_v12 = vpack.c.bf16 %v303_v8, %v302_v7  ;;  %v5471_v14 = vld [vmem:[#allocation2] sm:$0xff] }
  0x4c   :  { %5118 = vmatpush3.bf16.msra.mxu0 %v5115_v3  ;;  %v5127_v13 = vpack.c.bf16 %v305_v10, %v304_v9  ;;  %v90_v15 = vld [vmem:[#allocation4 + $0x10] sm:$0xff]  ;;  %4851 = vmatprep.mubr.msk.f32.mxu1 %vm108_vm0, %v5471_v14  ;;  %v91_v17 = vld [vmem:[#allocation4 + $0x18] sm:$0xff]  ;;  %v92_v18 = vld [vmem:[#allocation4 + $0x20] sm:$0xff] }
  0x4d   :  { %5120 = vmatprep.subr.bf16.mxu0 %v5119_v6  ;;  %5124 = vmatprep.subr.bf16.mxu1 %v5123_v12  ;;  %v5479_v19 = vld [vmem:[#allocation2 + $0x8] sm:$0xff]  ;;  %v5483_v21 = vld [vmem:[#allocation2 + $0x10] sm:$0xff]  ;;  %v5493_v23 = vld [vmem:[#allocation2 + $0x18] sm:$0xff] }
  0x4e   :  { %5126 = vmatpush3.bf16.msra.mxu1 %v5123_v12  ;;  %v93_v20 = vld [vmem:[#allocation4 + $0x28] sm:$0xff]  ;;  %v94_v22 = vld [vmem:[#allocation4 + $0x30] sm:$0xff]  ;;  %v95_v24 = vld [vmem:[#allocation4 + $0x38] sm:$0xff] }
  0x4f   :  { %5128 = vmatprep.subr.bf16.mxu1 %v5127_v13  ;;  %v5496_v25 = vld [vmem:[#allocation2 + $0x20] sm:$0xff]  ;;  %v5503_v27 = vld [vmem:[#allocation2 + $0x28] sm:$0xff]  ;;  %v5508_v29 = vld [vmem:[#allocation2 + $0x30] sm:$0xff] }
  0x50   :  { %5122 = vmatpush3.bf16.msra.mxu0 %v5119_v6  ;;  %v96_v26 = vld [vmem:[#allocation4 + $0x40] sm:$0xff]  ;;  %v97_v28 = vld [vmem:[#allocation4 + $0x48] sm:$0xff]  ;;  %v98_v30 = vld [vmem:[#allocation4 + $0x50] sm:$0xff] }
  0x51   :  { %4875 = vmatprep.subr.mxu0 %v5368_v16  ;;  %v5516_v31 = vld [vmem:[#allocation2 + $0x38] sm:$0xff]  ;;  %v5519_v33 = vld [vmem:[#allocation2 + $0x40] sm:$0xff]  ;;  %v5526_v35 = vld [vmem:[#allocation2 + $0x48] sm:$0xff] }
  0x52   :  { %5130 = vmatpush3.bf16.msra.mxu1 %v5127_v13  ;;  %v99_v32 = vld [vmem:[#allocation4 + $0x58] sm:$0xff]  ;;  %v100_v34 = vld [vmem:[#allocation4 + $0x60] sm:$0xff]  ;;  %v101_v36 = vld [vmem:[#allocation4 + $0x68] sm:$0xff] }
  0x53   :  { %4820 = vmatmul.mubr.msk.f32.vlgmr.msra.gmra.mrb[0].mxu0 %vm108_vm0, %v89_v11  ;;  %4880 = vmatprep.subr.mxu1 %v5368_v16  ;;  %v5529_v37 = vld [vmem:[#allocation2 + $0x50] sm:$0xff]  ;;  %v5536_v39 = vld [vmem:[#allocation2 + $0x58] sm:$0xff]  ;;  %v5539_v41 = vld [vmem:[#allocation2 + $0x60] sm:$0xff] }
  0x54   :  { %4822 = vmatprep.mubr.msk.f32.mxu0 %vm108_vm0, %v90_v15  ;;  %v102_v38 = vld [vmem:[#allocation4 + $0x70] sm:$0xff]  ;;  %v103_v40 = vld [vmem:[#allocation4 + $0x78] sm:$0xff]  ;;  %v5546_v42 = vld [vmem:[#allocation2 + $0x68] sm:$0xff] }
  0x55   :  { %4852 = vmatmul.mubr.msk.f32.vlgmr.msra.gmra.mrb[0].mxu1 %vm108_vm0, %v5479_v19  ;;  %v5548_v43 = vld [vmem:[#allocation2 + $0x70] sm:$0xff]  ;;  %v5554_v44 = vld [vmem:[#allocation2 + $0x78] sm:$0xff] }
  0x56   :  { %4854 = vmatprep.mubr.msk.f32.mxu1 %vm108_vm0, %v5483_v21 }
  0x57   :  { %4823 = vmatmul.mubr.msk.f32.gmra.mrb[2].mxu0 %vm108_vm0, %v91_v17  ;;  %v4100_v17 = vmul.f32 %v5471_v14, %v5471_v14 }
  0x58   :  { %4825 = vmatprep.mubr.msk.f32.mxu0 %vm108_vm0, %v92_v18  ;;  %v4102_v18 = vmul.f32 %v5483_v21, %v5483_v21 }
  0x59   :  { %4876 = vmatpush3.xpose.msk.msra.mxu0 %vm108_vm0, %v5471_v14  ;;  %4855 = vmatmul.mubr.msk.f32.gmra.mrb[2].mxu1 %vm108_vm0, %v5493_v23 }
  0x5a   :  { %4885 = vmatprep.subr.mxu0 %v5368_v16  ;;  %4857 = vmatprep.mubr.msk.f32.mxu1 %vm108_vm0, %v5496_v25 }
  0x5b   :  { %4826 = vmatmul.mubr.msk.f32.gmra.mrb[4].mxu0 %vm108_vm0, %v93_v20  ;;  %4881 = vmatpush3.xpose.msk.msra.mxu1 %vm108_vm0, %v5479_v19  ;;  %v4101_v20 = vmul.f32 %v5479_v19, %v5479_v19 }
  0x5c   :  { %4828 = vmatprep.mubr.msk.f32.mxu0 %vm108_vm0, %v94_v22  ;;  %4890 = vmatprep.subr.mxu1 %v5368_v16  ;;  %v4104_v22 = vmul.f32 %v5496_v25, %v5496_v25 }
  0x5d   :  { %4858 = vmatmul.mubr.msk.f32.gmra.mrb[4].mxu1 %vm108_vm0, %v5503_v27 }
  0x5e   :  { %4860 = vmatprep.mubr.msk.f32.mxu1 %vm108_vm0, %v5508_v29 }
  0x5f   :  { %4829 = vmatmul.mubr.msk.f32.gmra.mrb[6].mxu0 %vm108_vm0, %v95_v24  ;;  %v4116_v24 = vsel %vm108_vm0, %v4100_v17, 0.0 }
  0x60   :  { %4831 = vmatprep.mubr.msk.f32.mxu0 %vm108_vm0, %v96_v26  ;;  %v4119_v26 = vsel %vm108_vm0, %v4101_v20, 0.0 }
  0x61   :  { %4861 = vmatmul.mubr.msk.f32.gmra.mrb[6].mxu1 %vm108_vm0, %v5516_v31 }
  0x62   :  { %4863 = vmatprep.mubr.msk.f32.mxu1 %vm108_vm0, %v5519_v33 }
  0x63   :  { %4832 = vmatmul.mubr.msk.f32.gmra.mrb[8].mxu0 %vm108_vm0, %v97_v28  ;;  %v4122_v28 = vsel %vm108_vm0, %v4102_v18, 0.0 }
  0x64   :  { %4834 = vmatprep.mubr.msk.f32.mxu0 %vm108_vm0, %v98_v30  ;;  %v4103_v30 = vmul.f32 %v5493_v23, %v5493_v23 }
  0x65   :  { %4864 = vmatmul.mubr.msk.f32.gmra.mrb[8].mxu1 %vm108_vm0, %v5526_v35 }
  0x66   :  { %4866 = vmatprep.mubr.msk.f32.mxu1 %vm108_vm0, %v5529_v37 }
  0x67   :  { %4835 = vmatmul.mubr.msk.f32.gmra.mrb[10].mxu0 %vm108_vm0, %v99_v32  ;;  %v4128_v32 = vsel %vm108_vm0, %v4104_v22, 0.0 }
  0x68   :  { %4837 = vmatprep.mubr.msk.f32.mxu0 %vm108_vm0, %v100_v34  ;;  %v4106_v34 = vmul.f32 %v5508_v29, %v5508_v29 }
  0x69   :  { %4867 = vmatmul.mubr.msk.f32.gmra.mrb[10].mxu1 %vm108_vm0, %v5536_v39 }
  0x6a   :  { %4869 = vmatprep.mubr.msk.f32.mxu1 %vm108_vm0, %v5539_v41 }
  0x6b   :  { %4838 = vmatmul.mubr.msk.f32.gmra.mrb[12].mxu0 %vm108_vm0, %v101_v36  ;;  %v4125_v36 = vsel %vm108_vm0, %v4103_v30, 0.0 }
  0x6c   :  { %4840 = vmatprep.mubr.msk.f32.mxu0 %vm108_vm0, %v102_v38  ;;  %v4105_v38 = vmul.f32 %v5503_v27, %v5503_v27 }
  0x6d   :  { %4870 = vmatmul.mubr.msk.f32.gmra.mrb[12].mxu1 %vm108_vm0, %v5546_v42 }
  0x6e   :  { %4872 = vmatprep.mubr.msk.f32.mxu1 %vm108_vm0, %v5548_v43 }
  0x6f   :  { %4841 = vmatmul.mubr.msk.f32.gmra.mrb[14].mxu0 %vm108_vm0, %v103_v40  ;;  %v4134_v40 = vsel %vm108_vm0, %v4106_v34, 0.0 }
  0x70   :  { %4877 = vmatprep.mubr.msk.f32.mxu0 %vm5369_vm1, %v5368_v16 }
  0x71   :  { %4873 = vmatmul.mubr.msk.f32.gmra.mrb[14].mxu1 %vm108_vm0, %v5554_v44 }
  0x72   :  { %4882 = vmatprep.mubr.msk.f32.mxu1 %vm5369_vm1, %v5368_v16 }
 0x126   :  { %v4821_v45 = vpop.f32.mrb[0].mxu0 }
 0x127   :  { %v223_v46 = vpop.f32.mrb[1].mxu0  ;;  %4883 = vmatmul.mubr.msk.f32.vlgmr.msra.gmra.mrb[16].mxu1 %vm108_vm0, %v4821_v45 }
 0x128   :  { %1683 = vrot.lane.b32.xlu0 %v223_v46, %s5370_s3  ;;  %4878 = vmatmul.mubr.msk.f32.vlgmr.msra.gmra.mrb[16].mxu0 %vm108_vm0, %v223_v46  ;;  %v5628_v58 = vpop.f32.mrb[0].mxu1  ;;  %v4107_v46 = vmul.f32 %v5516_v31, %v5516_v31 }
 0x129   :  { %4891 = vmatpush3.xpose.msk.msra.mxu1 %vm108_vm0, %v5493_v23  ;;  %4886 = vmatpush3.xpose.msk.msra.mxu0 %vm108_vm0, %v5483_v21  ;;  %v5633_v60 = vpop.f32.mrb[1].mxu1 }
 0x12a   :  { %v4824_v47 = vpop.f32.mrb[2].mxu0  ;;  %4892 = vmatprep.mubr.msk.f32.mxu1 %vm5369_vm1, %v5368_v16  ;;  %4887 = vmatprep.mubr.msk.f32.mxu0 %vm5369_vm1, %v5368_v16 }
 0x12b   :  { %1912 = vrot.lane.b32.xlu1 %v4824_v47, %s5370_s3  ;;  %v233_v48 = vpop.f32.mrb[3].mxu0  ;;  %4900 = vmatprep.subr.mxu1 %v5368_v16 }
 0x12c   :  { %4893 = vmatmul.mubr.msk.f32.vlgmr.msra.gmra.mrb[18].mxu1 %vm108_vm0, %v4824_v47  ;;  %1760 = vrot.lane.b32.xlu0 %v4821_v45, %s5370_s3  ;;  %v5637_v61 = vpop.f32.mrb[2].mxu1  ;;  %v4131_v45 = vsel %vm108_vm0, %v4105_v38, 0.0  ;;  %v4137_v47 = vsel %vm108_vm0, %v4107_v46, 0.0 }
 0x12d   :  { %4888 = vmatmul.mubr.msk.f32.vlgmr.msra.gmra.mrb[18].mxu0 %vm108_vm0, %v233_v48  ;;  %4895 = vmatprep.subr.mxu0 %v5368_v16  ;;  %v5641_v62 = vpop.f32.mrb[3].mxu1 }
 0x12e   :  { %4901 = vmatpush3.xpose.msk.msra.mxu1 %vm108_vm0, %v5503_v27  ;;  %4896 = vmatpush3.xpose.msk.msra.mxu0 %vm108_vm0, %v5496_v25  ;;  %v4827_v49 = vpop.f32.mrb[4].mxu0 }
 0x12f   :  { %4902 = vmatprep.mubr.msk.f32.mxu1 %vm5369_vm1, %v5368_v16  ;;  %1836 = vrot.lane.b32.xlu1 %v233_v48, %s5370_s3  ;;  %v243_v50 = vpop.f32.mrb[5].mxu0 }
 0x130   :  { %4897 = vmatprep.mubr.msk.f32.mxu0 %vm5369_vm1, %v5368_v16  ;;  %4910 = vmatprep.subr.mxu1 %v5368_v16  ;;  %v5647_v0 = vpop.f32.mrb[4].mxu1 }
 0x131   :  { %4903 = vmatmul.mubr.msk.f32.vlgmr.msra.gmra.mrb[20].mxu1 %vm108_vm0, %v4827_v49  ;;  %1988 = vrot.lane.b32.xlu0 %v243_v50, %s5370_s3  ;;  %v5652_v2 = vpop.f32.mrb[5].mxu1 }
 0x132   :  { %4898 = vmatmul.mubr.msk.f32.vlgmr.msra.gmra.mrb[20].mxu0 %vm108_vm0, %v243_v50  ;;  %4905 = vmatprep.subr.mxu0 %v5368_v16  ;;  %v4830_v51 = vpop.f32.mrb[6].mxu0 }
 0x133   :  { %4911 = vmatpush3.xpose.msk.msra.mxu1 %vm108_vm0, %v5516_v31  ;;  %4906 = vmatpush3.xpose.msk.msra.mxu0 %vm108_vm0, %v5508_v29  ;;  %v253_v52 = vpop.f32.mrb[7].mxu0 }
 0x134   :  { %4912 = vmatprep.mubr.msk.f32.mxu1 %vm5369_vm1, %v5368_v16  ;;  %2064 = vrot.lane.b32.xlu1 %v4827_v49, %s5370_s3  ;;  %v5657_v3 = vpop.f32.mrb[6].mxu1 }
 0x135   :  { %4907 = vmatprep.mubr.msk.f32.mxu0 %vm5369_vm1, %v5368_v16  ;;  %4920 = vmatprep.subr.mxu1 %v5368_v16  ;;  %v5661_v4 = vpop.f32.mrb[7].mxu1 }
 0x136   :  { %4913 = vmatmul.mubr.msk.f32.vlgmr.msra.gmra.mrb[22].mxu1 %vm108_vm0, %v4830_v51  ;;  %2140 = vrot.lane.b32.xlu0 %v253_v52, %s5370_s3  ;;  %v4833_v53 = vpop.f32.mrb[8].mxu0 }
 0x137   :  { %4908 = vmatmul.mubr.msk.f32.vlgmr.msra.gmra.mrb[22].mxu0 %vm108_vm0, %v253_v52  ;;  %4915 = vmatprep.subr.mxu0 %v5368_v16  ;;  %v263_v54 = vpop.f32.mrb[9].mxu0 }
 0x138   :  { %4921 = vmatpush3.xpose.msk.msra.mxu1 %vm108_vm0, %v5526_v35  ;;  %4916 = vmatpush3.xpose.msk.msra.mxu0 %vm108_vm0, %v5519_v33  ;;  %v5665_v5 = vpop.f32.mrb[8].mxu1 }
 0x139   :  { %4922 = vmatprep.mubr.msk.f32.mxu1 %vm5369_vm1, %v5368_v16  ;;  %2216 = vrot.lane.b32.xlu1 %v4830_v51, %s5370_s3  ;;  %v5671_v6 = vpop.f32.mrb[9].mxu1 }
 0x13a   :  { %4917 = vmatprep.mubr.msk.f32.mxu0 %vm5369_vm1, %v5368_v16  ;;  %4930 = vmatprep.subr.mxu1 %v5368_v16  ;;  %v4836_v55 = vpop.f32.mrb[10].mxu0 }
 0x13b   :  { %4923 = vmatmul.mubr.msk.f32.vlgmr.msra.gmra.mrb[24].mxu1 %vm108_vm0, %v4833_v53  ;;  %2292 = vrot.lane.b32.xlu0 %v263_v54, %s5370_s3  ;;  %v273_v56 = vpop.f32.mrb[11].mxu0 }
 0x13c   :  { %4918 = vmatmul.mubr.msk.f32.vlgmr.msra.gmra.mrb[24].mxu0 %vm108_vm0, %v263_v54  ;;  %4925 = vmatprep.subr.mxu0 %v5368_v16  ;;  %v5676_v7 = vpop.f32.mrb[10].mxu1 }
 0x13d   :  { %4931 = vmatpush3.xpose.msk.msra.mxu1 %vm108_vm0, %v5536_v39  ;;  %4926 = vmatpush3.xpose.msk.msra.mxu0 %vm108_vm0, %v5529_v37  ;;  %v5681_v8 = vpop.f32.mrb[11].mxu1 }
 0x13e   :  { %4932 = vmatprep.mubr.msk.f32.mxu1 %vm5369_vm1, %v5368_v16  ;;  %2368 = vrot.lane.b32.xlu1 %v4833_v53, %s5370_s3  ;;  %v4839_v57 = vpop.f32.mrb[12].mxu0 }
 0x13f   :  { %4927 = vmatprep.mubr.msk.f32.mxu0 %vm5369_vm1, %v5368_v16  ;;  %4940 = vmatprep.subr.mxu1 %v5368_v16  ;;  %v283_v59 = vpop.f32.mrb[13].mxu0 }
 0x140   :  { %4933 = vmatmul.mubr.msk.f32.vlgmr.msra.gmra.mrb[26].mxu1 %vm108_vm0, %v4836_v55  ;;  %2444 = vrot.lane.b32.xlu0 %v273_v56, %s5370_s3  ;;  %v5685_v9 = vpop.f32.mrb[12].mxu1 }
 0x141   :  { %4928 = vmatmul.mubr.msk.f32.vlgmr.msra.gmra.mrb[26].mxu0 %vm108_vm0, %v273_v56  ;;  %4935 = vmatprep.subr.mxu0 %v5368_v16  ;;  %v5689_v10 = vpop.f32.mrb[13].mxu1 }
 0x142   :  { %4941 = vmatpush3.xpose.msk.msra.mxu1 %vm108_vm0, %v5546_v42  ;;  %4936 = vmatpush3.xpose.msk.msra.mxu0 %vm108_vm0, %v5539_v41  ;;  %v4842_v63 = vpop.f32.mrb[14].mxu0 }
 0x143   :  { %4942 = vmatprep.mubr.msk.f32.mxu1 %vm5369_vm1, %v5368_v16  ;;  %2520 = vrot.lane.b32.xlu1 %v4836_v55, %s5370_s3  ;;  %v293_v1 = vpop.f32.mrb[15].mxu0 }
 0x144   :  { %4937 = vmatprep.mubr.msk.f32.mxu0 %vm5369_vm1, %v5368_v16  ;;  %4950 = vmatprep.subr.mxu1 %v5368_v16  ;;  %v5692_v11 = vpop.f32.mrb[14].mxu1 }
 0x145   :  { %4943 = vmatmul.mubr.msk.f32.vlgmr.msra.gmra.mrb[28].mxu1 %vm108_vm0, %v4839_v57  ;;  %2596 = vrot.lane.b32.xlu0 %v283_v59, %s5370_s3  ;;  %v5696_v12 = vpop.f32.mrb[15].mxu1 }
 0x146   :  { %4938 = vmatmul.mubr.msk.f32.vlgmr.msra.gmra.mrb[28].mxu0 %vm108_vm0, %v283_v59  ;;  %4945 = vmatprep.subr.mxu0 %v5368_v16 }
 0x147   :  { %4951 = vmatpush3.xpose.msk.msra.mxu1 %vm108_vm0, %v5554_v44  ;;  %4946 = vmatpush3.xpose.msk.msra.mxu0 %vm108_vm0, %v5548_v43 }
 0x148   :  { %4952 = vmatprep.mubr.msk.f32.mxu1 %vm5369_vm1, %v5368_v16  ;;  %2672 = vrot.lane.b32.xlu1 %v4839_v57, %s5370_s3 }
 0x149   :  { %4947 = vmatprep.mubr.msk.f32.mxu0 %vm5369_vm1, %v5368_v16  ;;  %2748 = vrot.lane.b32.xlu0 %v293_v1, %s5370_s3 }
 0x14a   :  { %4953 = vmatmul.mubr.msk.f32.vlgmr.msra.gmra.mrb[30].mxu1 %vm108_vm0, %v4842_v63  ;;  %4948 = vmatmul.mubr.msk.f32.vlgmr.msra.gmra.mrb[30].mxu0 %vm108_vm0, %v293_v1 }
 0x14b   :  { %4955 = vmatprep.subr.mxu0 %v5368_v16  ;;  %4960 = vmatprep.subr.mxu1 %v5368_v16 }
 0x14c   :  { %2824 = vrot.lane.b32.xlu1 %v4842_v63, %s5370_s3  ;;  %4962 = vmatprep.mubr.msk.f32.mxu1 %vm5369_vm1, %v5368_v16 }
 0x14d   :  { %4957 = vmatprep.mubr.msk.f32.mxu0 %vm5369_vm1, %v5368_v16 }
 0x168   :  { %4117 = vadd.xlane.f32.xlu0 %v4116_v24 }
 0x16c   :  { %4123 = vadd.xlane.f32.xlu0 %v4122_v28 }
 0x170   :  { %4120 = vadd.xlane.f32.xlu1 %v4119_v26  ;;  %4126 = vadd.xlane.f32.xlu0 %v4125_v36 }
 0x174   :  { %4129 = vadd.xlane.f32.xlu1 %v4128_v32  ;;  %4132 = vadd.xlane.f32.xlu0 %v4131_v45 }
 0x178   :  { %4135 = vadd.xlane.f32.xlu1 %v4134_v40  ;;  %4138 = vadd.xlane.f32.xlu0 %v4137_v47 }
 0x19a   :  { %v1684_v13 = vpop.permute.xlu0 %1683 }
 0x19b   :  { %4956 = vmatpush3.msra.mxu0 %v1684_v13 }
 0x19c   :  { %4965 = vmatprep.subr.mxu0 %v5368_v16 }
 0x19d   :  { %v1913_v48 = vpop.permute.xlu1 %1912 }
 0x19e   :  { %v1761_v15 = vpop.permute.xlu0 %1760 }
 0x19f   :  { %4961 = vmatpush3.msra.mxu1 %v1761_v15 }
 0x1a0   :  { %4970 = vmatprep.subr.mxu1 %v5368_v16 }
 0x1a1   :  { %v1837_v53 = vpop.permute.xlu1 %1836 }
 0x1a3   :  { %v1989_v18 = vpop.permute.xlu0 %1988 }
 0x1a6   :  { %v2065_v59 = vpop.permute.xlu1 %2064 }
 0x1a8   :  { %v2141_v36 = vpop.permute.xlu0 %2140 }
 0x1ab   :  { %v2217_v22 = vpop.permute.xlu1 %2216 }
 0x1fa   :  { %v641_v49 = vpop.f32.mrb[16].mxu1 }
 0x1fb   :  { %5140 = vtanh.f32 %v641_v49  ;;  %v568_v50 = vpop.f32.mrb[16].mxu0  ;;  %v4884_v51 = vpop.f32.mrb[17].mxu1 }
 0x1fc   :  { %5142 = vtanh.f32 %v568_v50  ;;  %v4879_v52 = vpop.f32.mrb[17].mxu0  ;;  %v2293_v50 = vpop.permute.xlu0 %2292 }
 0x1ff   :  { %v787_v54 = vpop.f32.mrb[18].mxu1 }
 0x200   :  { %5144 = vtanh.f32 %v787_v54  ;;  %v714_v55 = vpop.f32.mrb[18].mxu0  ;;  %v4894_v56 = vpop.f32.mrb[19].mxu1 }
 0x201   :  { %5146 = vtanh.f32 %v714_v55  ;;  %v4889_v57 = vpop.f32.mrb[19].mxu0 }
 0x204   :  { %v933_v63 = vpop.f32.mrb[20].mxu1 }
 0x205   :  { %v5141_v1 = vpop.eup %5140  ;;  %5148 = vtanh.f32 %v933_v63  ;;  %v860_v13 = vpop.f32.mrb[20].mxu0 }
 0x206   :  { %v4904_v15 = vpop.f32.mrb[21].mxu1  ;;  %v5143_v17 = vpop.eup %5142  ;;  %5150 = vtanh.f32 %v860_v13  ;;  %4963 = vmatmul.mubr.msk.f32.vlgmr.msra.gmra.mrb[32].mxu1 %vm1686_vm2, %v5141_v1 }
 0x207   :  { %v4899_v20 = vpop.f32.mrb[21].mxu0  ;;  %4971 = vmatpush3.msra.mxu1 %v1913_v48  ;;  %4958 = vmatmul.mubr.msk.f32.vlgmr.msra.gmra.mrb[32].mxu0 %vm1686_vm2, %v5143_v17  ;;  %v2369_v48 = vpop.permute.xlu1 %2368 }
 0x208   :  { %4966 = vmatpush3.msra.mxu0 %v1837_v53  ;;  %4972 = vmatprep.mubr.msk.f32.mxu1 %vm5369_vm1, %v5368_v16 }
 0x209   :  { %v1079_v24 = vpop.f32.mrb[22].mxu1  ;;  %4980 = vmatprep.subr.mxu1 %v5368_v16  ;;  %4967 = vmatprep.mubr.msk.f32.mxu0 %vm5369_vm1, %v5368_v16 }
 0x20a   :  { %v5145_v26 = vpop.eup %5144  ;;  %5152 = vtanh.f32 %v1079_v24  ;;  %v1006_v28 = vpop.f32.mrb[22].mxu0  ;;  %4975 = vmatprep.subr.mxu0 %v5368_v16 }
 0x20b   :  { %v4914_v30 = vpop.f32.mrb[23].mxu1  ;;  %v5147_v32 = vpop.eup %5146  ;;  %5154 = vtanh.f32 %v1006_v28  ;;  %4973 = vmatmul.mubr.msk.f32.vlgmr.msra.gmra.mrb[34].mxu1 %vm1686_vm2, %v5145_v26 }
 0x20c   :  { %v4909_v34 = vpop.f32.mrb[23].mxu0  ;;  %4981 = vmatpush3.msra.mxu1 %v2065_v59  ;;  %4968 = vmatmul.mubr.msk.f32.vlgmr.msra.gmra.mrb[34].mxu0 %vm1686_vm2, %v5147_v32  ;;  %v2521_v57 = vpop.permute.xlu1 %2520 }
 0x20d   :  { %4976 = vmatpush3.msra.mxu0 %v1989_v18  ;;  %4982 = vmatprep.mubr.msk.f32.mxu1 %vm5369_vm1, %v5368_v16  ;;  %v2445_v59 = vpop.permute.xlu0 %2444 }
 0x20e   :  { %v1225_v38 = vpop.f32.mrb[24].mxu1  ;;  %4990 = vmatprep.subr.mxu1 %v5368_v16  ;;  %4977 = vmatprep.mubr.msk.f32.mxu0 %vm5369_vm1, %v5368_v16 }
 0x20f   :  { %v5149_v40 = vpop.eup %5148  ;;  %5156 = vtanh.f32 %v1225_v38  ;;  %v1152_v45 = vpop.f32.mrb[24].mxu0  ;;  %4985 = vmatprep.subr.mxu0 %v5368_v16 }
 0x210   :  { %v4924_v46 = vpop.f32.mrb[25].mxu1  ;;  %v5151_v47 = vpop.eup %5150  ;;  %5158 = vtanh.f32 %v1152_v45  ;;  %4983 = vmatmul.mubr.msk.f32.vlgmr.msra.gmra.mrb[36].mxu1 %vm1686_vm2, %v5149_v40 }
 0x211   :  { %v4919_v49 = vpop.f32.mrb[25].mxu0  ;;  %4991 = vmatpush3.msra.mxu1 %v2217_v22  ;;  %4978 = vmatmul.mubr.msk.f32.vlgmr.msra.gmra.mrb[36].mxu0 %vm1686_vm2, %v5151_v47  ;;  %v2673_v20 = vpop.permute.xlu1 %2672 }
 0x212   :  { %4986 = vmatpush3.msra.mxu0 %v2141_v36  ;;  %4992 = vmatprep.mubr.msk.f32.mxu1 %vm5369_vm1, %v5368_v16  ;;  %v2597_v34 = vpop.permute.xlu0 %2596  ;;  %v4108_v49 = vmul.f32 %v5519_v33, %v5519_v33 }
 0x213   :  { %v1371_v51 = vpop.f32.mrb[26].mxu1  ;;  %5000 = vmatprep.subr.mxu1 %v5368_v16  ;;  %4987 = vmatprep.mubr.msk.f32.mxu0 %vm5369_vm1, %v5368_v16 }
 0x214   :  { %v5153_v52 = vpop.eup %5152  ;;  %5160 = vtanh.f32 %v1371_v51  ;;  %v1298_v53 = vpop.f32.mrb[26].mxu0  ;;  %4995 = vmatprep.subr.mxu0 %v5368_v16  ;;  %v4140_v51 = vsel %vm108_vm0, %v4108_v49, 0.0 }
 0x215   :  { %v4934_v54 = vpop.f32.mrb[27].mxu1  ;;  %v5155_v55 = vpop.eup %5154  ;;  %5162 = vtanh.f32 %v1298_v53  ;;  %4993 = vmatmul.mubr.msk.f32.vlgmr.msra.gmra.mrb[38].mxu1 %vm1686_vm2, %v5153_v52  ;;  %4141 = vadd.xlane.f32.xlu1 %v4140_v51  ;;  %v4111_v52 = vmul.f32 %v5536_v39, %v5536_v39  ;;  %v4110_v53 = vmul.f32 %v5529_v37, %v5529_v37 }
 0x216   :  { %v4929_v56 = vpop.f32.mrb[27].mxu0  ;;  %5001 = vmatpush3.msra.mxu1 %v2369_v48  ;;  %4988 = vmatmul.mubr.msk.f32.vlgmr.msra.gmra.mrb[38].mxu0 %vm1686_vm2, %v5155_v55  ;;  %v2825_v40 = vpop.permute.xlu1 %2824  ;;  %v4109_v48 = vmul.f32 %v5526_v35, %v5526_v35 }
 0x217   :  { %4996 = vmatpush3.msra.mxu0 %v2293_v50  ;;  %5002 = vmatprep.mubr.msk.f32.mxu1 %vm5369_vm1, %v5368_v16  ;;  %v2749_v45 = vpop.permute.xlu0 %2748  ;;  %v4149_v54 = vsel %vm108_vm0, %v4111_v52, 0.0  ;;  %v4146_v55 = vsel %vm108_vm0, %v4110_v53, 0.0  ;;  %v4113_v56 = vmul.f32 %v5546_v42, %v5546_v42 }
 0x218   :  { %v1517_v63 = vpop.f32.mrb[28].mxu1  ;;  %5010 = vmatprep.subr.mxu1 %v5368_v16  ;;  %4997 = vmatprep.mubr.msk.f32.mxu0 %vm5369_vm1, %v5368_v16  ;;  %v4143_v50 = vsel %vm108_vm0, %v4109_v48, 0.0 }
 0x219   :  { %v5157_v1 = vpop.eup %5156  ;;  %5164 = vtanh.f32 %v1517_v63  ;;  %v1444_v13 = vpop.f32.mrb[28].mxu0  ;;  %5005 = vmatprep.subr.mxu0 %v5368_v16  ;;  %4144 = vadd.xlane.f32.xlu0 %v4143_v50 }
 0x21a   :  { %v4944_v15 = vpop.f32.mrb[29].mxu1  ;;  %v5159_v17 = vpop.eup %5158  ;;  %5166 = vtanh.f32 %v1444_v13  ;;  %5003 = vmatmul.mubr.msk.f32.vlgmr.msra.gmra.mrb[40].mxu1 %vm1686_vm2, %v5157_v1  ;;  %4147 = vadd.xlane.f32.xlu1 %v4146_v55  ;;  %v4115_v1 = vmul.f32 %v5554_v44, %v5554_v44  ;;  %v4114_v13 = vmul.f32 %v5548_v43, %v5548_v43 }
 0x21b   :  { %v4939_v18 = vpop.f32.mrb[29].mxu0  ;;  %5011 = vmatpush3.msra.mxu1 %v2521_v57  ;;  %4998 = vmatmul.mubr.msk.f32.vlgmr.msra.gmra.mrb[40].mxu0 %vm1686_vm2, %v5159_v17  ;;  %v4112_v57 = vmul.f32 %v5539_v41, %v5539_v41 }
 0x21c   :  { %5006 = vmatpush3.msra.mxu0 %v2445_v59  ;;  %5012 = vmatprep.mubr.msk.f32.mxu1 %vm5369_vm1, %v5368_v16  ;;  %v4155_v59 = vsel %vm108_vm0, %v4113_v56, 0.0  ;;  %v4161_v15 = vsel %vm108_vm0, %v4115_v1, 0.0  ;;  %v4158_v17 = vsel %vm108_vm0, %v4114_v13, 0.0 }
 0x21d   :  { %v1663_v22 = vpop.f32.mrb[30].mxu1  ;;  %v1590_v24 = vpop.f32.mrb[30].mxu0  ;;  %5020 = vmatprep.subr.mxu1 %v5368_v16  ;;  %5007 = vmatprep.mubr.msk.f32.mxu0 %vm5369_vm1, %v5368_v16  ;;  %v4152_v63 = vsel %vm108_vm0, %v4112_v57, 0.0 }
 0x21e   :  { %v5161_v26 = vpop.eup %5160  ;;  %5168 = vtanh.f32 %v1663_v22  ;;  %v4954_v28 = vpop.f32.mrb[31].mxu1  ;;  %5015 = vmatprep.subr.mxu0 %v5368_v16  ;;  %4150 = vadd.xlane.f32.xlu0 %v4149_v54 }
 0x21f   :  { %v4949_v30 = vpop.f32.mrb[31].mxu0  ;;  %v5163_v32 = vpop.eup %5162  ;;  %5170 = vtanh.f32 %v1590_v24  ;;  %5013 = vmatmul.mubr.msk.f32.vlgmr.msra.gmra.mrb[42].mxu1 %vm1686_vm2, %v5161_v26  ;;  %4153 = vadd.xlane.f32.xlu1 %v4152_v63 }
 0x220   :  { %5021 = vmatpush3.msra.mxu1 %v2673_v20  ;;  %5008 = vmatmul.mubr.msk.f32.vlgmr.msra.gmra.mrb[42].mxu0 %vm1686_vm2, %v5163_v32 }
 0x221   :  { %5016 = vmatpush3.msra.mxu0 %v2597_v34  ;;  %5022 = vmatprep.mubr.msk.f32.mxu1 %vm5369_vm1, %v5368_v16 }
 0x222   :  { %5030 = vmatprep.subr.mxu1 %v5368_v16  ;;  %5017 = vmatprep.mubr.msk.f32.mxu0 %vm5369_vm1, %v5368_v16 }
 0x223   :  { %v5165_v36 = vpop.eup %5164  ;;  %5025 = vmatprep.subr.mxu0 %v5368_v16  ;;  %4156 = vadd.xlane.f32.xlu0 %v4155_v59 }
 0x224   :  { %v5167_v38 = vpop.eup %5166  ;;  %5023 = vmatmul.mubr.msk.f32.vlgmr.msra.gmra.mrb[44].mxu1 %vm1686_vm2, %v5165_v36  ;;  %4159 = vadd.xlane.f32.xlu1 %v4158_v17 }
 0x225   :  { %5031 = vmatpush3.msra.mxu1 %v2825_v40  ;;  %5018 = vmatmul.mubr.msk.f32.vlgmr.msra.gmra.mrb[44].mxu0 %vm1686_vm2, %v5167_v38 }
 0x226   :  { %5026 = vmatpush3.msra.mxu0 %v2749_v45  ;;  %5032 = vmatprep.mubr.msk.f32.mxu1 %vm5369_vm1, %v5368_v16 }
 0x227   :  { %5027 = vmatprep.mubr.msk.f32.mxu0 %vm5369_vm1, %v5368_v16  ;;  %5040 = vmatprep.subr.mxu1 %v5368_v16 }
 0x228   :  { %v5169_v46 = vpop.eup %5168  ;;  %5035 = vmatprep.subr.mxu0 %v5368_v16  ;;  %4162 = vadd.xlane.f32.xlu0 %v4161_v15 }
 0x229   :  { %v5171_v47 = vpop.eup %5170  ;;  %5033 = vmatmul.mubr.msk.f32.vlgmr.msra.gmra.mrb[46].mxu1 %vm1686_vm2, %v5169_v46 }
 0x22a   :  { %5028 = vmatmul.mubr.msk.f32.vlgmr.msra.gmra.mrb[46].mxu0 %vm1686_vm2, %v5171_v47  ;;  %5042 = vmatprep.mubr.msk.f32.mxu1 %vm5369_vm1, %v5368_v16 }
 0x22b   :  { %5037 = vmatprep.mubr.msk.f32.mxu0 %vm5369_vm1, %v5368_v16 }
 0x2d9   :  { %v1832_v18 = vpop.f32.mrb[32].mxu1 }
 0x2da   :  { %v2901_v20 = vadd.f32 %v5628_v58, %v1832_v18  ;;  %v1756_v22 = vpop.f32.mrb[32].mxu0  ;;  %v4964_v24 = vpop.f32.mrb[33].mxu1 }
 0x2db   :  { %v2900_v26 = vadd.f32 %v1756_v22, %v5633_v60  ;;  %v4959_v28 = vpop.f32.mrb[33].mxu0 }
 0x2dc   :  { %5172 = vtanh.f32 %v2901_v20 }
 0x2dd   :  { %5174 = vtanh.f32 %v2900_v26 }
 0x2de   :  { %v1984_v30 = vpop.f32.mrb[34].mxu1 }
 0x2df   :  { %v2903_v32 = vadd.f32 %v5637_v61, %v1984_v30  ;;  %v1908_v34 = vpop.f32.mrb[34].mxu0  ;;  %v4974_v36 = vpop.f32.mrb[35].mxu1 }
 0x2e0   :  { %v2902_v38 = vadd.f32 %v1908_v34, %v5641_v62  ;;  %v4969_v40 = vpop.f32.mrb[35].mxu0 }
 0x2e1   :  { %5176 = vtanh.f32 %v2903_v32 }
 0x2e2   :  { %5178 = vtanh.f32 %v2902_v38 }
 0x2e3   :  { %v2136_v45 = vpop.f32.mrb[36].mxu1 }
 0x2e4   :  { %v2905_v58 = vadd.f32 %v5647_v0, %v2136_v45  ;;  %v2060_v46 = vpop.f32.mrb[36].mxu0  ;;  %v4984_v47 = vpop.f32.mrb[37].mxu1 }
 0x2e5   :  { %v2904_v60 = vadd.f32 %v2060_v46, %v5652_v2  ;;  %v4979_v48 = vpop.f32.mrb[37].mxu0 }
 0x2e6   :  { %v5173_v49 = vpop.eup %5172  ;;  %5180 = vtanh.f32 %v2905_v58 }
 0x2e7   :  { %v5175_v50 = vpop.eup %5174  ;;  %5182 = vtanh.f32 %v2904_v60  ;;  %5041 = vmatpush3.xpose.msk.msra.mxu1 %vm108_vm0, %v5173_v49  ;;  %v4197_v61 = vmul.f32 %v5173_v49, %v5173_v49 }
 0x2e8   :  { %v2288_v51 = vpop.f32.mrb[38].mxu1  ;;  %5036 = vmatpush3.xpose.msk.msra.mxu0 %vm108_vm0, %v5175_v50  ;;  %5050 = vmatprep.subr.mxu1 %v5368_v16  ;;  %v4196_v62 = vmul.f32 %v5175_v50, %v5175_v50 }
 0x2e9   :  { %v2907_v0 = vadd.f32 %v5657_v3, %v2288_v51  ;;  %v2212_v52 = vpop.f32.mrb[38].mxu0  ;;  %v4994_v53 = vpop.f32.mrb[39].mxu1  ;;  %v4215_v2 = vsel %vm108_vm0, %v4197_v61, 0.0  ;;  %5045 = vmatprep.subr.mxu0 %v5368_v16 }
 0x2ea   :  { %v2906_v54 = vadd.f32 %v2212_v52, %v5661_v4  ;;  %v4989_v55 = vpop.f32.mrb[39].mxu0  ;;  %4216 = vadd.xlane.f32.xlu0 %v4215_v2  ;;  %5043 = vmatmul.mubr.msk.f32.vlgmr.msra.gmra.mrb[48].mxu1 %vm108_vm0, %v5479_v19  ;;  %v4212_v56 = vsel %vm108_vm0, %v4196_v62, 0.0 }
 0x2eb   :  { %v5177_v57 = vpop.eup %5176  ;;  %5184 = vtanh.f32 %v2907_v0  ;;  %4213 = vadd.xlane.f32.xlu1 %v4212_v56  ;;  %5038 = vmatmul.mubr.msk.f32.vlgmr.msra.gmra.mrb[48].mxu0 %vm108_vm0, %v5471_v14 }
 0x2ec   :  { %v5179_v3 = vpop.eup %5178  ;;  %5186 = vtanh.f32 %v2906_v54  ;;  %5051 = vmatpush3.xpose.msk.msra.mxu1 %vm108_vm0, %v5177_v57  ;;  %5052 = vmatprep.mubr.msk.f32.mxu1 %vm5369_vm1, %v5368_v16  ;;  %v4199_v4 = vmul.f32 %v5177_v57, %v5177_v57 }
 0x2ed   :  { %v2440_v59 = vpop.f32.mrb[40].mxu1  ;;  %5046 = vmatpush3.xpose.msk.msra.mxu0 %vm108_vm0, %v5179_v3  ;;  %5047 = vmatprep.mubr.msk.f32.mxu0 %vm5369_vm1, %v5368_v16  ;;  %v4198_v19 = vmul.f32 %v5179_v3, %v5179_v3 }
 0x2ee   :  { %v2909_v63 = vadd.f32 %v5665_v5, %v2440_v59  ;;  %v2364_v1 = vpop.f32.mrb[40].mxu0  ;;  %v5004_v13 = vpop.f32.mrb[41].mxu1  ;;  %v4221_v14 = vsel %vm108_vm0, %v4199_v4, 0.0  ;;  %5060 = vmatprep.subr.mxu1 %v5368_v16  ;;  %5055 = vmatprep.subr.mxu0 %v5368_v16 }
 0x2ef   :  { %v2908_v15 = vadd.f32 %v2364_v1, %v5671_v6  ;;  %v4999_v17 = vpop.f32.mrb[41].mxu0  ;;  %4222 = vadd.xlane.f32.xlu0 %v4221_v14  ;;  %5053 = vmatmul.mubr.msk.f32.vlgmr.msra.gmra.mrb[50].mxu1 %vm108_vm0, %v5493_v23  ;;  %v4218_v18 = vsel %vm108_vm0, %v4198_v19, 0.0  ;;  %v4121_v14 = vpop.xlane.xlu1 %4120 }
 0x2f0   :  { %v5181_v20 = vpop.eup %5180  ;;  %5188 = vtanh.f32 %v2909_v63  ;;  %4219 = vadd.xlane.f32.xlu1 %v4218_v18  ;;  %5048 = vmatmul.mubr.msk.f32.vlgmr.msra.gmra.mrb[50].mxu0 %vm108_vm0, %v5483_v21  ;;  %v4118_v63 = vpop.xlane.xlu0 %4117 }
 0x2f1   :  { %v5183_v5 = vpop.eup %5182  ;;  %5190 = vtanh.f32 %v2908_v15  ;;  %5061 = vmatpush3.xpose.msk.msra.mxu1 %vm108_vm0, %v5181_v20  ;;  %5062 = vmatprep.mubr.msk.f32.mxu1 %vm5369_vm1, %v5368_v16  ;;  %v4201_v6 = vmul.f32 %v5181_v20, %v5181_v20 }
 0x2f2   :  { %v2592_v22 = vpop.f32.mrb[42].mxu1  ;;  %5056 = vmatpush3.xpose.msk.msra.mxu0 %vm108_vm0, %v5183_v5  ;;  %5057 = vmatprep.mubr.msk.f32.mxu0 %vm5369_vm1, %v5368_v16  ;;  %v4200_v23 = vmul.f32 %v5183_v5, %v5183_v5 }
 0x2f3   :  { %v2911_v24 = vadd.f32 %v5676_v7, %v2592_v22  ;;  %v2516_v26 = vpop.f32.mrb[42].mxu0  ;;  %v5014_v28 = vpop.f32.mrb[43].mxu1  ;;  %v4227_v21 = vsel %vm108_vm0, %v4201_v6, 0.0  ;;  %5070 = vmatprep.subr.mxu1 %v5368_v16  ;;  %5065 = vmatprep.subr.mxu0 %v5368_v16 }
 0x2f4   :  { %v2910_v30 = vadd.f32 %v2516_v26, %v5681_v8  ;;  %v5009_v32 = vpop.f32.mrb[43].mxu0  ;;  %4228 = vadd.xlane.f32.xlu0 %v4227_v21  ;;  %5063 = vmatmul.mubr.msk.f32.vlgmr.msra.gmra.mrb[52].mxu1 %vm108_vm0, %v5503_v27  ;;  %v4224_v34 = vsel %vm108_vm0, %v4200_v23, 0.0  ;;  %v4124_v1 = vpop.xlane.xlu0 %4123 }
 0x2f5   :  { %v5185_v36 = vpop.eup %5184  ;;  %5192 = vtanh.f32 %v2911_v24  ;;  %4225 = vadd.xlane.f32.xlu1 %v4224_v34  ;;  %5058 = vmatmul.mubr.msk.f32.vlgmr.msra.gmra.mrb[52].mxu0 %vm108_vm0, %v5496_v25  ;;  %v4130_v17 = vpop.xlane.xlu1 %4129 }
 0x2f6   :  { %v5187_v7 = vpop.eup %5186  ;;  %5194 = vtanh.f32 %v2910_v30  ;;  %5071 = vmatpush3.xpose.msk.msra.mxu1 %vm108_vm0, %v5185_v36  ;;  %5072 = vmatprep.mubr.msk.f32.mxu1 %vm5369_vm1, %v5368_v16  ;;  %v4203_v8 = vmul.f32 %v5185_v36, %v5185_v36 }
 0x2f7   :  { %v2744_v38 = vpop.f32.mrb[44].mxu1  ;;  %5066 = vmatpush3.xpose.msk.msra.mxu0 %vm108_vm0, %v5187_v7  ;;  %5067 = vmatprep.mubr.msk.f32.mxu0 %vm5369_vm1, %v5368_v16  ;;  %v4202_v27 = vmul.f32 %v5187_v7, %v5187_v7  ;;  %v4165_v7 = vmax.f32 %v4121_v14, 1e-16 }
 0x2f8   :  { %v2913_v40 = vadd.f32 %v5685_v9, %v2744_v38  ;;  %v2668_v45 = vpop.f32.mrb[44].mxu0  ;;  %v5024_v58 = vpop.f32.mrb[45].mxu1  ;;  %v4233_v25 = vsel %vm108_vm0, %v4203_v8, 0.0  ;;  %5080 = vmatprep.subr.mxu1 %v5368_v16  ;;  %5075 = vmatprep.subr.mxu0 %v5368_v16  ;;  %v4164_v38 = vmax.f32 %v4118_v63, 1e-16 }
 0x2f9   :  { %v2912_v46 = vadd.f32 %v2668_v45, %v5689_v10  ;;  %v5019_v47 = vpop.f32.mrb[45].mxu0  ;;  %4234 = vadd.xlane.f32.xlu0 %v4233_v25  ;;  %5073 = vmatmul.mubr.msk.f32.vlgmr.msra.gmra.mrb[54].mxu1 %vm108_vm0, %v5516_v31  ;;  %v4230_v60 = vsel %vm108_vm0, %v4202_v27, 0.0  ;;  %v4127_v13 = vpop.xlane.xlu0 %4126 }
 0x2fa   :  { %v5189_v48 = vpop.eup %5188  ;;  %5196 = vtanh.f32 %v2913_v40  ;;  %4231 = vadd.xlane.f32.xlu1 %v4230_v60  ;;  %5068 = vmatmul.mubr.msk.f32.vlgmr.msra.gmra.mrb[54].mxu0 %vm108_vm0, %v5508_v29  ;;  %v4136_v18 = vpop.xlane.xlu1 %4135  ;;  %v4324_v40 = vlaneseq  ;;  %v4167_v58 = vmax.f32 %v4127_v13, 1e-16 }
 0x2fb   :  { %v5191_v9 = vpop.eup %5190  ;;  %5198 = vtanh.f32 %v2912_v46  ;;  %5081 = vmatpush3.xpose.msk.msra.mxu1 %vm108_vm0, %v5189_v48  ;;  %5082 = vmatprep.mubr.msk.f32.mxu1 %vm5369_vm1, %v5368_v16  ;;  %v4205_v10 = vmul.f32 %v5189_v48, %v5189_v48  ;;  %v4166_v46 = vmax.f32 %v4124_v1, 1e-16 }
 0x2fc   :  { %v2896_v49 = vpop.f32.mrb[46].mxu1  ;;  %5076 = vmatpush3.xpose.msk.msra.mxu0 %vm108_vm0, %v5191_v9  ;;  %5077 = vmatprep.mubr.msk.f32.mxu0 %vm5369_vm1, %v5368_v16  ;;  %v4204_v31 = vmul.f32 %v5191_v9, %v5191_v9  ;;  %v4325_v60 = vand.u32 127, %v4324_v40  ;;  %v4327_v48 = vshrl.u32 %v4324_v40, 7 }
 0x2fd   :  { %v2915_v50 = vadd.f32 %v5692_v11, %v2896_v49  ;;  %v2820_v61 = vpop.f32.mrb[46].mxu0  ;;  %v5034_v51 = vpop.f32.mrb[47].mxu1  ;;  %v4239_v29 = vsel %vm108_vm0, %v4205_v10, 0.0  ;;  %5090 = vmatprep.subr.mxu1 %v5368_v16  ;;  %5085 = vmatprep.subr.mxu0 %v5368_v16 }
 0x2fe   :  { %v2914_v62 = vadd.f32 %v2820_v61, %v5696_v12  ;;  %v5029_v0 = vpop.f32.mrb[47].mxu0  ;;  %4240 = vadd.xlane.f32.xlu0 %v4239_v29  ;;  %5083 = vmatmul.mubr.msk.f32.vlgmr.msra.gmra.mrb[56].mxu1 %vm108_vm0, %v5526_v35  ;;  %v4236_v52 = vsel %vm108_vm0, %v4204_v31, 0.0  ;;  %v4133_v15 = vpop.xlane.xlu0 %4132  ;;  %v4168_v31 = vmax.f32 %v4130_v17, 1e-16  ;;  %v5952_v61 = vsub.s32 %v4325_v60, %v4327_v48 }
 0x2ff   :  { %v5193_v53 = vpop.eup %5192  ;;  %5200 = vtanh.f32 %v2915_v50  ;;  %4237 = vadd.xlane.f32.xlu1 %v4236_v52  ;;  %5078 = vmatmul.mubr.msk.f32.vlgmr.msra.gmra.mrb[56].mxu0 %vm108_vm0, %v5519_v33  ;;  %v5938_v5 = vpop.xlane.xlu1 %4141  ;;  %v4169_v49 = vmax.f32 %v4133_v15, 1e-16  ;;  %v4170_v29 = vmax.f32 %v4136_v18, 1e-16 }
 0x300   :  { %v5195_v11 = vpop.eup %5194  ;;  %5202 = vtanh.f32 %v2914_v62  ;;  %5091 = vmatpush3.xpose.msk.msra.mxu1 %vm108_vm0, %v5193_v53  ;;  %5092 = vmatprep.mubr.msk.f32.mxu1 %vm5369_vm1, %v5368_v16  ;;  %v4207_v12 = vmul.f32 %v5193_v53, %v5193_v53  ;;  %v4172_v18 = vmax.f32 %v5938_v5, 1e-16 }
 0x301   :  { %5086 = vmatpush3.xpose.msk.msra.mxu0 %vm108_vm0, %v5195_v11  ;;  %5087 = vmatprep.mubr.msk.f32.mxu0 %vm5369_vm1, %v5368_v16  ;;  %v4206_v35 = vmul.f32 %v5195_v11, %v5195_v11 }
 0x302   :  { %v4245_v2 = vsel %vm108_vm0, %v4207_v12, 0.0  ;;  %5100 = vmatprep.subr.mxu1 %v5368_v16  ;;  %5095 = vmatprep.subr.mxu0 %v5368_v16 }
 0x303   :  { %4246 = vadd.xlane.f32.xlu0 %v4245_v2  ;;  %5093 = vmatmul.mubr.msk.f32.vlgmr.msra.gmra.mrb[58].mxu1 %vm108_vm0, %v5536_v39  ;;  %v4242_v33 = vsel %vm108_vm0, %v4206_v35, 0.0  ;;  %v5942_v6 = vpop.xlane.xlu1 %4147 }
 0x304   :  { %v5197_v54 = vpop.eup %5196  ;;  %4243 = vadd.xlane.f32.xlu1 %v4242_v33  ;;  %5088 = vmatmul.mubr.msk.f32.vlgmr.msra.gmra.mrb[58].mxu0 %vm108_vm0, %v5529_v37 }
 0x305   :  { %v5199_v55 = vpop.eup %5198  ;;  %5101 = vmatpush3.xpose.msk.msra.mxu1 %vm108_vm0, %v5197_v54  ;;  %5102 = vmatprep.mubr.msk.f32.mxu1 %vm5369_vm1, %v5368_v16  ;;  %v4209_v56 = vmul.f32 %v5197_v54, %v5197_v54 }
 0x306   :  { %5096 = vmatpush3.xpose.msk.msra.mxu0 %vm108_vm0, %v5199_v55  ;;  %5097 = vmatprep.mubr.msk.f32.mxu0 %vm5369_vm1, %v5368_v16  ;;  %v4208_v39 = vmul.f32 %v5199_v55, %v5199_v55 }
 0x307   :  { %v4251_v57 = vsel %vm108_vm0, %v4209_v56, 0.0  ;;  %5110 = vmatprep.subr.mxu1 %v5368_v16  ;;  %5105 = vmatprep.subr.mxu0 %v5368_v16 }
 0x308   :  { %4252 = vadd.xlane.f32.xlu0 %v4251_v57  ;;  %5103 = vmatmul.mubr.msk.f32.vlgmr.msra.gmra.mrb[60].mxu1 %vm108_vm0, %v5546_v42  ;;  %v4248_v37 = vsel %vm108_vm0, %v4208_v39, 0.0 }
 0x309   :  { %v5201_v3 = vpop.eup %5200  ;;  %4249 = vadd.xlane.f32.xlu1 %v4248_v37  ;;  %5098 = vmatmul.mubr.msk.f32.vlgmr.msra.gmra.mrb[60].mxu0 %vm108_vm0, %v5539_v41 }
 0x30a   :  { %v5203_v4 = vpop.eup %5202  ;;  %5111 = vmatpush3.xpose.msk.msra.mxu1 %vm108_vm0, %v5201_v3  ;;  %5112 = vmatprep.mubr.msk.f32.mxu1 %vm5369_vm1, %v5368_v16  ;;  %v4211_v59 = vmul.f32 %v5201_v3, %v5201_v3 }
 0x30b   :  { %5106 = vmatpush3.xpose.msk.msra.mxu0 %vm108_vm0, %v5203_v4  ;;  %5107 = vmatprep.mubr.msk.f32.mxu0 %vm5369_vm1, %v5368_v16  ;;  %v4210_v42 = vmul.f32 %v5203_v4, %v5203_v4  ;;  %v5934_v16 = vpop.xlane.xlu0 %4138 }
 0x30c   :  { %v4257_v19 = vsel %vm108_vm0, %v4211_v59, 0.0  ;;  %v4171_v2 = vmax.f32 %v5934_v16, 1e-16 }
 0x30d   :  { %4258 = vadd.xlane.f32.xlu0 %v4257_v19  ;;  %5113 = vmatmul.mubr.msk.f32.vlgmr.msra.gmra.mrb[62].mxu1 %vm108_vm0, %v5554_v44  ;;  %v4254_v41 = vsel %vm108_vm0, %v4210_v42, 0.0 }
 0x30e   :  { %4255 = vadd.xlane.f32.xlu1 %v4254_v41  ;;  %5108 = vmatmul.mubr.msk.f32.vlgmr.msra.gmra.mrb[62].mxu0 %vm108_vm0, %v5548_v43  ;;  %v5946_v43 = vpop.xlane.xlu1 %4153 }
 0x30f   :  { %v5936_v20 = vpop.xlane.xlu0 %4144 }
 0x310   :  { %v4173_v4 = vmax.f32 %v5936_v20, 1e-16 }
 0x312   :  { %v5950_v24 = vpop.xlane.xlu1 %4159 }
 0x313   :  { %v5940_v44 = vpop.xlane.xlu0 %4150 }
 0x317   :  { %v5944_v22 = vpop.xlane.xlu0 %4156 }
 0x31b   :  { %v5948_v23 = vpop.xlane.xlu0 %4162 }
 0x377   :  { %v4217_v26 = vpop.xlane.xlu0 %4216 }
 0x378   :  { %v4214_v28 = vpop.xlane.xlu1 %4213  ;;  %v4261_v32 = vmax.f32 %v4217_v26, 1e-16 }
 0x379   :  { %v4260_v34 = vmax.f32 %v4214_v28, 1e-16 }
 0x37a   :  { %5204 = vrsqrt.f32 %v4261_v32 }
 0x37b   :  { %5206 = vrsqrt.f32 %v4260_v34 }
 0x37c   :  { %v4223_v21 = vpop.xlane.xlu0 %4222  ;;  %5208 = vrsqrt.f32 %v4165_v7 }
 0x37d   :  { %v4220_v30 = vpop.xlane.xlu1 %4219  ;;  %v4263_v27 = vmax.f32 %v4223_v21, 1e-16  ;;  %5210 = vrsqrt.f32 %v4164_v38 }
 0x37e   :  { %v4262_v45 = vmax.f32 %v4220_v30, 1e-16 }
 0x37f   :  { %5212 = vrsqrt.f32 %v4263_v27 }
 0x380   :  { %5214 = vrsqrt.f32 %v4262_v45 }
 0x381   :  { %v4229_v36 = vpop.xlane.xlu0 %4228  ;;  %5216 = vrsqrt.f32 %v4167_v58 }
 0x382   :  { %v4226_v8 = vpop.xlane.xlu1 %4225  ;;  %v4265_v9 = vmax.f32 %v4229_v36, 1e-16  ;;  %5218 = vrsqrt.f32 %v4166_v46 }
 0x383   :  { %v4264_v10 = vmax.f32 %v4226_v8, 1e-16  ;;  %v4175_v8 = vmax.f32 %v5940_v44, 1e-16  ;;  %v4174_v44 = vmax.f32 %v5942_v6, 1e-16 }
 0x384   :  { %v5205_v51 = vpop.eup %5204  ;;  %5220 = vrsqrt.f32 %v4265_v9 }
 0x385   :  { %v5207_v0 = vpop.eup %5206  ;;  %5222 = vrsqrt.f32 %v4264_v10  ;;  %v4333_v54 = vrot.slane %v5205_v51, %v5952_v61 }
 0x386   :  { %v4235_v25 = vpop.xlane.xlu0 %4234  ;;  %v5209_v53 = vpop.eup %5208  ;;  %5224 = vrsqrt.f32 %v4169_v49  ;;  %v4329_v57 = vrot.slane %v5207_v0, %v5952_v61 }
 0x387   :  { %v4232_v47 = vpop.xlane.xlu1 %4231  ;;  %v4267_v52 = vmax.f32 %v4235_v25, 1e-16  ;;  %v5211_v35 = vpop.eup %5210  ;;  %5226 = vrsqrt.f32 %v4168_v31 }
 0x388   :  { %v4266_v11 = vmax.f32 %v4232_v47, 1e-16  ;;  %5228 = vrsqrt.f32 %v4170_v29 }
 0x389   :  { %v5213_v3 = vpop.eup %5212  ;;  %5230 = vrsqrt.f32 %v4267_v52 }
 0x38a   :  { %v5215_v19 = vpop.eup %5214  ;;  %5232 = vrsqrt.f32 %v4266_v11  ;;  %v4341_v20 = vrot.slane %v5213_v3, %v5952_v61 }
 0x38b   :  { %v4241_v50 = vpop.xlane.xlu0 %4240  ;;  %v5217_v13 = vpop.eup %5216  ;;  %5234 = vrsqrt.f32 %v4171_v2  ;;  %v4337_v34 = vrot.slane %v5215_v19, %v5952_v61 }
 0x38c   :  { %v4238_v62 = vpop.xlane.xlu1 %4237  ;;  %v4269_v41 = vmax.f32 %v4241_v50, 1e-16  ;;  %v5219_v16 = vpop.eup %5218  ;;  %5236 = vrsqrt.f32 %v4173_v4 }
 0x38d   :  { %v4268_v14 = vmax.f32 %v4238_v62, 1e-16 }
 0x38e   :  { %v5221_v7 = vpop.eup %5220  ;;  %5238 = vrsqrt.f32 %v4269_v41 }
 0x38f   :  { %v5223_v38 = vpop.eup %5222  ;;  %5240 = vrsqrt.f32 %v4268_v14  ;;  %v4349_v49 = vrot.slane %v5221_v7, %v5952_v61  ;;  %v4178_v7 = vmax.f32 %v5950_v24, 1e-16 }
 0x390   :  { %v4247_v59 = vpop.xlane.xlu0 %4246  ;;  %v5225_v58 = vpop.eup %5224  ;;  %5242 = vrsqrt.f32 %v4172_v18  ;;  %v4345_v62 = vrot.slane %v5223_v38, %v5952_v61 }
 0x391   :  { %v4244_v63 = vpop.xlane.xlu1 %4243  ;;  %v4271_v27 = vmax.f32 %v4247_v59, 1e-16  ;;  %v5227_v48 = vpop.eup %5226  ;;  %5244 = vrsqrt.f32 %v4175_v8 }
 0x392   :  { %v4270_v25 = vmax.f32 %v4244_v63, 1e-16  ;;  %v5229_v51 = vpop.eup %5228 }
 0x393   :  { %v5231_v52 = vpop.eup %5230  ;;  %5246 = vrsqrt.f32 %v4271_v27 }
 0x394   :  { %5248 = vrsqrt.f32 %v4270_v25 }
 0x395   :  { %v4253_v40 = vpop.xlane.xlu0 %4252  ;;  %5250 = vrsqrt.f32 %v4174_v44 }
 0x396   :  { %v4250_v46 = vpop.xlane.xlu1 %4249  ;;  %v4273_v11 = vmax.f32 %v4253_v40, 1e-16 }
 0x397   :  { %v4272_v2 = vmax.f32 %v4250_v46, 1e-16 }
 0x398   :  { %5252 = vrsqrt.f32 %v4273_v11 }
 0x399   :  { %5254 = vrsqrt.f32 %v4272_v2 }
 0x39b   :  { %v4256_v19 = vpop.xlane.xlu1 %4255 }
 0x39c   :  { %v4274_v18 = vmax.f32 %v4256_v19, 1e-16 }
 0x3bd   :  { %v3074_v12 = vpop.f32.mrb[48].mxu1 }
 0x3be   :  { %v4293_v33 = vmul.f32 %v5209_v53, %v3074_v12  ;;  %v3001_v55 = vpop.f32.mrb[48].mxu0  ;;  %v5044_v56 = vpop.f32.mrb[49].mxu1 }
 0x3bf   :  { %v4292_v39 = vmul.f32 %v5211_v35, %v3001_v55  ;;  %v5039_v37 = vpop.f32.mrb[49].mxu0  ;;  %v5233_v53 = vpop.eup %5232  ;;  %v4177_v56 = vmax.f32 %v5944_v22, 1e-16 }
 0x3c0   :  { %v4509_v42 = vmul.f32 %v4333_v54, %v4293_v33  ;;  %v5235_v35 = vpop.eup %5234  ;;  %v4259_v33 = vpop.xlane.xlu0 %4258  ;;  %v4357_v37 = vrot.slane %v5231_v52, %v5952_v61  ;;  %v4353_v63 = vrot.slane %v5233_v53, %v5952_v61 }
 0x3c1   :  { %v4508_v1 = vmul.f32 %v4329_v57, %v4292_v39  ;;  %v5237_v59 = vpop.eup %5236  ;;  %5256 = vrsqrt.f32 %v4177_v56 }
 0x3c2   :  { %v4525_v15 = vmax.f32 %v4509_v42, 0.0  ;;  %v3220_v17 = vpop.f32.mrb[50].mxu1  ;;  %v4176_v42 = vmax.f32 %v5946_v43, 1e-16  ;;  %v5239_v22 = vpop.eup %5238  ;;  %v4275_v43 = vmax.f32 %v4259_v33, 1e-16 }
 0x3c3   :  { %v4524_v26 = vmax.f32 %v4508_v1, 0.0  ;;  %v4295_v28 = vmul.f32 %v5217_v13, %v3220_v17  ;;  %v3147_v21 = vpop.f32.mrb[50].mxu0  ;;  %v5054_v30 = vpop.f32.mrb[51].mxu1 }
 0x3c4   :  { %4541 = vst.msk [vmem:[%s6047_s4 + $0x8] sm:$0xff] %vm1686_vm2, %v4525_v15  ;;  %v4294_v32 = vmul.f32 %v5219_v16, %v3147_v21  ;;  %v5049_v36 = vpop.f32.mrb[51].mxu0  ;;  %v5241_v14 = vpop.eup %5240  ;;  %v4179_v16 = vmax.f32 %v5948_v23, 1e-16  ;;  %5258 = vrsqrt.f32 %v4176_v42  ;;  %v4365_v30 = vrot.slane %v5239_v22, %v5952_v61 }
 0x3c5   :  { %4540 = vst.msk [vmem:[%s6047_s4] sm:$0xff] %vm1686_vm2, %v4524_v26  ;;  %v4511_v5 = vmul.f32 %v4341_v20, %v4295_v28  ;;  %v5243_v17 = vpop.eup %5242  ;;  %v4361_v23 = vrot.slane %v5241_v14, %v5952_v61  ;;  %5260 = vrsqrt.f32 %v4275_v43 }
 0x3c6   :  { %v4510_v45 = vmul.f32 %v4337_v34, %v4294_v32  ;;  %v5245_v36 = vpop.eup %5244  ;;  %5262 = vrsqrt.f32 %v4274_v18 }
 0x3c7   :  { %v4527_v47 = vmax.f32 %v4511_v5, 0.0  ;;  %v3366_v60 = vpop.f32.mrb[52].mxu1  ;;  %v5247_v38 = vpop.eup %5246  ;;  %5264 = vrsqrt.f32 %v4179_v16 }
 0x3c8   :  { %v4526_v9 = vmax.f32 %v4510_v45, 0.0  ;;  %v4297_v10 = vmul.f32 %v5225_v58, %v3366_v60  ;;  %v3293_v31 = vpop.f32.mrb[52].mxu0  ;;  %v5064_v50 = vpop.f32.mrb[53].mxu1  ;;  %5266 = vrsqrt.f32 %v4178_v7  ;;  %v4373_v60 = vrot.slane %v5247_v38, %v5952_v61 }
 0x3c9   :  { %4543 = vst.msk [vmem:[%s6047_s4 + $0x18] sm:$0xff] %vm1686_vm2, %v4527_v47  ;;  %v4296_v29 = vmul.f32 %v5227_v48, %v3293_v31  ;;  %v5059_v0 = vpop.f32.mrb[53].mxu0  ;;  %v5249_v40 = vpop.eup %5248 }
 0x3ca   :  { %4542 = vst.msk [vmem:[%s6047_s4 + $0x10] sm:$0xff] %vm1686_vm2, %v4526_v9  ;;  %v4513_v6 = vmul.f32 %v4349_v49, %v4297_v10  ;;  %v5251_v45 = vpop.eup %5250  ;;  %v4369_v10 = vrot.slane %v5249_v40, %v5952_v61 }
 0x3cb   :  { %v4512_v12 = vmul.f32 %v4345_v62, %v4296_v29  ;;  %v5253_v31 = vpop.eup %5252 }
 0x3cc   :  { %v4529_v54 = vmax.f32 %v4513_v6, 0.0  ;;  %v3512_v55 = vpop.f32.mrb[54].mxu1 }
 0x3cd   :  { %v4528_v39 = vmax.f32 %v4512_v12, 0.0  ;;  %v4299_v57 = vmul.f32 %v5235_v35, %v3512_v55  ;;  %v3439_v3 = vpop.f32.mrb[54].mxu0  ;;  %v5074_v4 = vpop.f32.mrb[55].mxu1  ;;  %v4381_v12 = vrot.slane %v5253_v31, %v5952_v61 }
 0x3ce   :  { %4545 = vst.msk [vmem:[%s6047_s4 + $0x28] sm:$0xff] %vm1686_vm2, %v4529_v54  ;;  %v4298_v41 = vmul.f32 %v5229_v51, %v3439_v3  ;;  %v5069_v1 = vpop.f32.mrb[55].mxu0  ;;  %v5255_v51 = vpop.eup %5254 }
 0x3cf   :  { %4544 = vst.msk [vmem:[%s6047_s4 + $0x20] sm:$0xff] %vm1686_vm2, %v4528_v39  ;;  %v4515_v13 = vmul.f32 %v4357_v37, %v4299_v57  ;;  %v5257_v62 = vpop.eup %5256  ;;  %v4377_v54 = vrot.slane %v5255_v51, %v5952_v61 }
 0x3d0   :  { %v4514_v15 = vmul.f32 %v4353_v63, %v4298_v41  ;;  %v5259_v6 = vpop.eup %5258 }
 0x3d1   :  { %v4531_v26 = vmax.f32 %v4515_v13, 0.0  ;;  %v3658_v28 = vpop.f32.mrb[56].mxu1  ;;  %v5261_v56 = vpop.eup %5260 }
 0x3d2   :  { %v4530_v20 = vmax.f32 %v4514_v15, 0.0  ;;  %v4301_v21 = vmul.f32 %v5237_v59, %v3658_v28  ;;  %v3585_v32 = vpop.f32.mrb[56].mxu0  ;;  %v5084_v34 = vpop.f32.mrb[57].mxu1  ;;  %v4389_v63 = vrot.slane %v5261_v56, %v5952_v61 }
 0x3d3   :  { %4547 = vst.msk [vmem:[%s6047_s4 + $0x38] sm:$0xff] %vm1686_vm2, %v4531_v26  ;;  %v4300_v8 = vmul.f32 %v5243_v17, %v3585_v32  ;;  %v5079_v5 = vpop.f32.mrb[57].mxu0  ;;  %v5263_v57 = vpop.eup %5262 }
 0x3d4   :  { %4546 = vst.msk [vmem:[%s6047_s4 + $0x30] sm:$0xff] %vm1686_vm2, %v4530_v20  ;;  %v4517_v27 = vmul.f32 %v4365_v30, %v4301_v21  ;;  %v5265_v3 = vpop.eup %5264  ;;  %v4385_v14 = vrot.slane %v5263_v57, %v5952_v61 }
 0x3d5   :  { %v4516_v24 = vmul.f32 %v4361_v23, %v4300_v8  ;;  %v5267_v42 = vpop.eup %5266 }
 0x3d6   :  { %v4533_v58 = vmax.f32 %v4517_v27, 0.0  ;;  %v3804_v25 = vpop.f32.mrb[58].mxu1 }
 0x3d7   :  { %v4532_v46 = vmax.f32 %v4516_v24, 0.0  ;;  %v4303_v47 = vmul.f32 %v5245_v36, %v3804_v25  ;;  %v3731_v48 = vpop.f32.mrb[58].mxu0  ;;  %v5094_v44 = vpop.f32.mrb[59].mxu1 }
 0x3d8   :  { %4549 = vst.msk [vmem:[%s6047_s4 + $0x48] sm:$0xff] %vm1686_vm2, %v4533_v58  ;;  %v4302_v9 = vmul.f32 %v5251_v45, %v3731_v48  ;;  %v5089_v49 = vpop.f32.mrb[59].mxu0 }
 0x3d9   :  { %4548 = vst.msk [vmem:[%s6047_s4 + $0x40] sm:$0xff] %vm1686_vm2, %v4532_v46  ;;  %v4519_v50 = vmul.f32 %v4373_v60, %v4303_v47 }
 0x3da   :  { %v4518_v29 = vmul.f32 %v4369_v10, %v4302_v9 }
 0x3db   :  { %v4535_v0 = vmax.f32 %v4519_v50, 0.0  ;;  %v3950_v52 = vpop.f32.mrb[60].mxu1 }
 0x3dc   :  { %v4534_v53 = vmax.f32 %v4518_v29, 0.0  ;;  %v4305_v11 = vmul.f32 %v5257_v62, %v3950_v52  ;;  %v3877_v35 = vpop.f32.mrb[60].mxu0  ;;  %v5104_v2 = vpop.f32.mrb[61].mxu1 }
 0x3dd   :  { %4551 = vst.msk [vmem:[%s6047_s4 + $0x58] sm:$0xff] %vm1686_vm2, %v4535_v0  ;;  %v4304_v33 = vmul.f32 %v5259_v6, %v3877_v35  ;;  %v5099_v55 = vpop.f32.mrb[61].mxu0 }
 0x3de   :  { %4550 = vst.msk [vmem:[%s6047_s4 + $0x50] sm:$0xff] %vm1686_vm2, %v4534_v53  ;;  %v4521_v39 = vmul.f32 %v4381_v12, %v4305_v11 }
 0x3df   :  { %v4520_v37 = vmul.f32 %v4377_v54, %v4304_v33 }
 0x3e0   :  { %v4537_v4 = vmax.f32 %v4521_v39, 0.0  ;;  %v4096_v59 = vpop.f32.mrb[62].mxu1 }
 0x3e1   :  { %v4536_v19 = vmax.f32 %v4520_v37, 0.0  ;;  %v4307_v41 = vmul.f32 %v5265_v3, %v4096_v59  ;;  %v4023_v1 = vpop.f32.mrb[62].mxu0  ;;  %v5114_v22 = vpop.f32.mrb[63].mxu1 }
 0x3e2   :  { %4553 = vst.msk [vmem:[%s6047_s4 + $0x68] sm:$0xff] %vm1686_vm2, %v4537_v4  ;;  %v4306_v13 = vmul.f32 %v5267_v42, %v4023_v1  ;;  %v5109_v43 = vpop.f32.mrb[63].mxu0 }
 0x3e3   :  { %4552 = vst.msk [vmem:[%s6047_s4 + $0x60] sm:$0xff] %vm1686_vm2, %v4536_v19  ;;  %v4523_v15 = vmul.f32 %v4389_v63, %v4307_v41 }
 0x3e4   :  { %v4522_v17 = vmul.f32 %v4385_v14, %v4306_v13 }
 0x3e5   :  { %v4539_v16 = vmax.f32 %v4523_v15, 0.0 }
 0x3e6   :  { %v4538_v18 = vmax.f32 %v4522_v17, 0.0 }
 0x3e7   :  { %4555 = vst.msk [vmem:[%s6047_s4 + $0x78] sm:$0xff] %vm1686_vm2, %v4539_v16 }
 0x3e8   :  { %4554 = vst.msk [vmem:[%s6047_s4 + $0x70] sm:$0xff] %vm1686_vm2, %v4538_v18 }
 0x3e9   :  { %4560 = vsyncpa [#allocation3], 1 }
 0x3ea   :  { %4561 = vsyncpa [#allocation5], 1 }
 0x3eb   :  { %4562 = vsyncpa [#allocation8], 1 }

</bundles_post_ra>
